<compile_context>
chip_gen: v6e
topology: v6e:2x2x1
jax: 0.10.0
libtpu: 0.0.40
codegen_flags: <defaults>
</compile_context>

<pallas_src>
import numpy as np
import jax
import jax.numpy as jnp
from jax.experimental import pallas as pl
from jax.experimental.pallas import tpu as pltpu

_BN_EPS = 1e-5
_A = -0.75  # PyTorch bicubic coefficient


def _cubic_w(s, a=_A):
    s = abs(float(s))
    if s <= 1.0:
        return (a + 2.0) * s ** 3 - (a + 3.0) * s ** 2 + 1.0
    if s < 2.0:
        return a * (s ** 3 - 5.0 * s ** 2 + 8.0 * s - 4.0)
    return 0.0


def _bicubic_matrix(n_in):
    """(2*n_in, n_in) bicubic x2 matrix (align_corners=False, index clamping)."""
    n_out = 2 * n_in
    m = np.zeros((n_out, n_in), np.float32)
    for jo in range(n_out):
        x = (jo + 0.5) * 0.5 - 0.5
        f = int(np.floor(x))
        for t in range(f - 1, f + 3):
            m[jo, min(max(t, 0), n_in - 1)] += _cubic_w(x - t)
    return jnp.asarray(m)


# --------------------------------------------------------------------------
# Fused kernel (one batch element per grid step; everything stays in VMEM)
# --------------------------------------------------------------------------
def up_conv_fused_kernel(x1_ref, x2_ref, cmup_ref, rmat_ref, bup_ref,
                         m1a_ref, m1b_ref, b1_ref, m2_ref, b2_ref, out_ref):
    """Whole Up_Conv forward for one batch element, lane-packed (rows, W*C)."""

    def band_conv3x3(x, m_ref):
        # 'same' 3x3 conv as three banded MXU matmuls (one per kernel row ky).
        # dx shifts, zero padding along W and the channel mix live inside the
        # constant matrices; the ky shift is a +/-1 row shift of the partials.
        t0 = jnp.dot(x, m_ref[0], preferred_element_type=jnp.float32)
        t1 = jnp.dot(x, m_ref[1], preferred_element_type=jnp.float32)
        t2 = jnp.dot(x, m_ref[2], preferred_element_type=jnp.float32)
        z = jnp.zeros((1, t1.shape[1]), jnp.float32)
        return (jnp.concatenate([z, t0[:-1, :]], axis=0) + t1 +
                jnp.concatenate([t2[1:, :], z], axis=0))

    # ---- bicubic x2 upsample + 1x1 conv: two lane-dense MXU matmuls --------
    # cmup = kron(cmat.T, w_up.T): the column interpolation and the 1x1
    # channel mix are folded into one constant (1x1 conv commutes with the
    # per-channel linear upsample); rows are then upsampled with rmat.
    colup = jnp.dot(x1_ref[0], cmup_ref[...],
                    preferred_element_type=jnp.float32)               # (H, W2*Ch)
    y1 = jnp.dot(rmat_ref[...], colup,
                 preferred_element_type=jnp.float32) + bup_ref[...]   # (H2, W2*Ch)

    # ---- decoder: concat + double (3x3 conv + folded BN + ReLU) ------------
    # cat([x2, y1], channel) is realized by splitting conv1 into two banded
    # convs (x2 branch + y1 branch), so no per-pixel channel interleave.
    d1 = jnp.maximum(band_conv3x3(x2_ref[0], m1a_ref) +
                     band_conv3x3(y1, m1b_ref) + b1_ref[...], 0.0)    # (H2, W2*Cout)
    d2 = jnp.maximum(band_conv3x3(d1, m2_ref) + b2_ref[...], 0.0)     # (H2, W2*Cout)

    out_ref[...] = d2[None, :, :].astype(out_ref.dtype)


# --------------------------------------------------------------------------
# Parameter-only preprocessing (constant folding, no feature-map compute)
# --------------------------------------------------------------------------
def _fold_bn(w, b, gamma, beta, mean, var):
    scale = gamma / jnp.sqrt(var + _BN_EPS)
    return w * scale[:, None, None, None], (b - mean) * scale + beta


def _band_matrices(w_oihw, w_img):
    """(3, w_img*Ci, w_img*Co) banded constants for a 'same' 3x3 conv.

    m[ky][(w+kx-1)*Ci + ci, w*Co + co] = w_oihw[co, ci, ky, kx] for valid
    0 <= w+kx-1 < w_img (out-of-range taps are simply absent == zero padding).
    """
    mats = []
    for ky in range(3):
        m = None
        for kx in range(3):
            shift = jnp.eye(w_img, k=1 - kx, dtype=jnp.float32)  # src col = dst col + kx - 1
            blk = jnp.kron(shift, jnp.transpose(w_oihw[:, :, ky, kx]))
            m = blk if m is None else m + blk
        mats.append(m)
    return jnp.stack(mats, axis=0)


def _vmem_limit_bytes():
    # per-generation cap: ~48 MiB on v7x (64 MiB physical), ~96 MiB on v5e/v6e.
    try:
        cap = pltpu.get_tpu_info().vmem_capacity_bytes
    except Exception:
        cap = 64 * 1024 * 1024
    return int(min(96 * 1024 * 1024, (cap * 3) // 4))


# --------------------------------------------------------------------------
# Wrapper
# --------------------------------------------------------------------------
def up_conv_forward(x1, x2, params):
    """Forward of Up_Conv. x1: (B, Cin, H, W), x2: (B, Cin//2, 2H, 2W), NCHW."""
    B, Cin, H, W = x1.shape
    Ch = Cin // 2
    Cout = params["w_c1"].shape[0]
    H2, W2 = 2 * H, 2 * W

    # boundary layout plumbing only: NCHW -> lane-packed NHWC row slabs
    x1_p = jnp.transpose(x1, (0, 2, 3, 1)).reshape(B, H, W * Cin)     # lanes = W*Cin
    x2_p = jnp.transpose(x2, (0, 2, 3, 1)).reshape(B, H2, W2 * Ch)    # lanes = W2*Ch

    # ---- constants / parameter-only folding ----
    rmat = _bicubic_matrix(H)                                          # (H2, H)
    cmat = _bicubic_matrix(W)                                          # (W2, W)
    w_up_t = jnp.transpose(params["w_up"][:, :, 0, 0], (1, 0))         # (Cin, Ch)
    cmup = jnp.kron(jnp.transpose(cmat), w_up_t)                       # (W*Cin, W2*Ch)
    bup_t = jnp.tile(params["b_up"], W2)[None, :]                      # (1, W2*Ch)

    # TODO(synk): BatchNorm2d is folded in eval mode (running stats); training-mode
    # batch statistics are not computed inside the kernel.
    w1_f, b1_f = _fold_bn(params["w_c1"], params["b_c1"], params["bn1_g"],
                          params["bn1_b"], params["bn1_m"], params["bn1_v"])
    w2_f, b2_f = _fold_bn(params["w_c2"], params["b_c2"], params["bn2_g"],
                          params["bn2_b"], params["bn2_m"], params["bn2_v"])
    # conv1 split over the channel concat: first Ch input channels come from
    # the skip (x2), the last Ch from the upsampled map (y1).
    m1a = _band_matrices(w1_f[:, :Ch], W2)                             # (3, W2*Ch, W2*Cout)
    m1b = _band_matrices(w1_f[:, Ch:], W2)                             # (3, W2*Ch, W2*Cout)
    m2 = _band_matrices(w2_f, W2)                                      # (3, W2*Cout, W2*Cout)
    b1_t = jnp.tile(b1_f, W2)[None, :]                                 # (1, W2*Cout)
    b2_t = jnp.tile(b2_f, W2)[None, :]                                 # (1, W2*Cout)

    out = pl.pallas_call(
        up_conv_fused_kernel,
        out_shape=jax.ShapeDtypeStruct((B, H2, W2 * Cout), jnp.float32),
        grid=(B,),
        in_specs=[
            pl.BlockSpec((1, H, W * Cin), lambda b: (b, 0, 0)),
            pl.BlockSpec((1, H2, W2 * Ch), lambda b: (b, 0, 0)),
            pl.BlockSpec((W * Cin, W2 * Ch), lambda b: (0, 0)),
            pl.BlockSpec((H2, H), lambda b: (0, 0)),
            pl.BlockSpec((1, W2 * Ch), lambda b: (0, 0)),
            pl.BlockSpec((3, W2 * Ch, W2 * Cout), lambda b: (0, 0, 0)),
            pl.BlockSpec((3, W2 * Ch, W2 * Cout), lambda b: (0, 0, 0)),
            pl.BlockSpec((1, W2 * Cout), lambda b: (0, 0)),
            pl.BlockSpec((3, W2 * Cout, W2 * Cout), lambda b: (0, 0, 0)),
            pl.BlockSpec((1, W2 * Cout), lambda b: (0, 0)),
        ],
        out_specs=pl.BlockSpec((1, H2, W2 * Cout), lambda b: (b, 0, 0)),
        compiler_params=pltpu.CompilerParams(
            dimension_semantics=("parallel",),
            vmem_limit_bytes=_vmem_limit_bytes()),
    )(x1_p, x2_p, cmup, rmat, bup_t, m1a, m1b, b1_t, m2, b2_t)

    # lane-dense slab -> module NCHW convention (layout plumbing only)
    return jnp.transpose(out.reshape(B, H2, W2, Cout), (0, 3, 1, 2))


# --------------------------------------------------------------------------
# Pure-JAX reference (PyTorch Up_Conv semantics, NCHW)
# --------------------------------------------------------------------------
def ref_up_conv(x1, x2, params):
    B, Cin, H, W = x1.shape
    rmat = _bicubic_matrix(H)
    cmat = _bicubic_matrix(W)
    up = jnp.einsum('oh,bchw->bcow', rmat, x1)
    up = jnp.einsum('pw,bcow->bcop', cmat, up)
    w_up = params["w_up"][:, :, 0, 0]
    y1 = jnp.einsum('oc,bchw->bohw', w_up, up) + params["b_up"][None, :, None, None]
    x = jnp.concatenate([x2, y1], axis=1)

    def conv_bn_relu(v, w, b, g, beta, m, var):
        y = jax.lax.conv_general_dilated(
            v, w, window_strides=(1, 1), padding=((1, 1), (1, 1)),
            dimension_numbers=('NCHW', 'OIHW', 'NCHW'))
        y = y + b[None, :, None, None]
        y = (y - m[None, :, None, None]) / jnp.sqrt(var[None, :, None, None] + _BN_EPS)
        y = y * g[None, :, None, None] + beta[None, :, None, None]
        return jnp.maximum(y, 0.0)

    d = conv_bn_relu(x, params["w_c1"], params["b_c1"], params["bn1_g"],
                     params["bn1_b"], params["bn1_m"], params["bn1_v"])
    d = conv_bn_relu(d, params["w_c2"], params["b_c2"], params["bn2_g"],
                     params["bn2_b"], params["bn2_m"], params["bn2_v"])
    return d


if __name__ == "__main__":
    # Up_Conv(channels_in=8, channels_out=8): x1 (pre-upsample) is 16x16,
    # x2 (skip connection) is 32x32 with channels_in//2 channels.
    B, Cin, Cout, H, W = 2, 8, 8, 16, 16
    Ch = Cin // 2

    key = jax.random.PRNGKey(0)
    ks = jax.random.split(key, 16)
    x1 = jax.random.normal(ks[0], (B, Cin, H, W), dtype=jnp.float32)
    x2 = jax.random.normal(ks[1], (B, Ch, 2 * H, 2 * W), dtype=jnp.float32)

    params = {
        "w_up": 0.1 * jax.random.normal(ks[2], (Ch, Cin, 1, 1), jnp.float32),
        "b_up": 0.1 * jax.random.normal(ks[3], (Ch,), jnp.float32),
        "w_c1": 0.1 * jax.random.normal(ks[4], (Cout, Cin, 3, 3), jnp.float32),
        "b_c1": 0.1 * jax.random.normal(ks[5], (Cout,), jnp.float32),
        "bn1_g": 1.0 + 0.1 * jax.random.normal(ks[6], (Cout,), jnp.float32),
        "bn1_b": 0.1 * jax.random.normal(ks[7], (Cout,), jnp.float32),
        "bn1_m": 0.1 * jax.random.normal(ks[8], (Cout,), jnp.float32),
        "bn1_v": jnp.abs(1.0 + 0.1 * jax.random.normal(ks[9], (Cout,), jnp.float32)),
        "w_c2": 0.1 * jax.random.normal(ks[10], (Cout, Cout, 3, 3), jnp.float32),
        "b_c2": 0.1 * jax.random.normal(ks[11], (Cout,), jnp.float32),
        "bn2_g": 1.0 + 0.1 * jax.random.normal(ks[12], (Cout,), jnp.float32),
        "bn2_b": 0.1 * jax.random.normal(ks[13], (Cout,), jnp.float32),
        "bn2_m": 0.1 * jax.random.normal(ks[14], (Cout,), jnp.float32),
        "bn2_v": jnp.abs(1.0 + 0.1 * jax.random.normal(ks[15], (Cout,), jnp.float32)),
    }

    fwd = jax.jit(lambda a, b: up_conv_forward(a, b, params))
    out = fwd(x1, x2)
    jax.block_until_ready(out)

    ref = ref_up_conv(x1, x2, params)
    assert out.shape == (B, Cout, 2 * H, 2 * W)
    max_err = float(jnp.max(jnp.abs(out - ref)))
    assert jnp.allclose(out, ref, atol=1e-3, rtol=1e-3), f"max abs err {max_err}"
    print("KERNEL_OK")
</pallas_src>

<mosaic_0001>
module attributes {stable_mosaic.version = 11 : i64} {
  func.func @up_conv_fused_kernel(%arg0: i32, %arg1: memref<1x16x128xf32, #tpu.memory_space<vmem>>, %arg2: memref<1x32x128xf32, #tpu.memory_space<vmem>>, %arg3: memref<128x128xf32, #tpu.memory_space<vmem>>, %arg4: memref<32x16xf32, #tpu.memory_space<vmem>>, %arg5: memref<1x128xf32, #tpu.memory_space<vmem>>, %arg6: memref<3x128x256xf32, #tpu.memory_space<vmem>>, %arg7: memref<3x128x256xf32, #tpu.memory_space<vmem>>, %arg8: memref<1x256xf32, #tpu.memory_space<vmem>>, %arg9: memref<3x256x256xf32, #tpu.memory_space<vmem>>, %arg10: memref<1x256xf32, #tpu.memory_space<vmem>>, %arg11: memref<1x32x256xf32, #tpu.memory_space<vmem>>) attributes {dimension_semantics = [#tpu.dimension_semantics<parallel>], iteration_bounds = array<i64: 2>, scalar_prefetch = 0 : i64, scratch_operands = 0 : i64, tpu.core_type = #tpu.core_type<tc>, window_params = [{transform_indices = @transform_0, window_bounds = array<i64: 1, 16, 128>}, {transform_indices = @transform_1, window_bounds = array<i64: 1, 32, 128>}, {pipeline_mode = #tpu.pipeline_mode<synchronous>, transform_indices = @transform_2, window_bounds = array<i64: 128, 128>}, {pipeline_mode = #tpu.pipeline_mode<synchronous>, transform_indices = @transform_3, window_bounds = array<i64: 32, 16>}, {pipeline_mode = #tpu.pipeline_mode<synchronous>, transform_indices = @transform_4, window_bounds = array<i64: 1, 128>}, {pipeline_mode = #tpu.pipeline_mode<synchronous>, transform_indices = @transform_5, window_bounds = array<i64: 3, 128, 256>}, {pipeline_mode = #tpu.pipeline_mode<synchronous>, transform_indices = @transform_6, window_bounds = array<i64: 3, 128, 256>}, {pipeline_mode = #tpu.pipeline_mode<synchronous>, transform_indices = @transform_7, window_bounds = array<i64: 1, 256>}, {pipeline_mode = #tpu.pipeline_mode<synchronous>, transform_indices = @transform_8, window_bounds = array<i64: 3, 256, 256>}, {pipeline_mode = #tpu.pipeline_mode<synchronous>, transform_indices = @transform_9, window_bounds = array<i64: 1, 256>}, {transform_indices = @transform_10, window_bounds = array<i64: 1, 32, 256>}]} {
    %c0 = arith.constant 0 : index
    %c0_0 = arith.constant 0 : index
    %c0_1 = arith.constant 0 : index
    %0 = vector.load %arg1[%c0, %c0_0, %c0_1] : memref<1x16x128xf32, #tpu.memory_space<vmem>>, vector<1x16x128xf32>
    %1 = vector.shape_cast %0 : vector<1x16x128xf32> to vector<16x128xf32>
    %c0_2 = arith.constant 0 : index
    %c0_3 = arith.constant 0 : index
    %2 = vector.load %arg3[%c0_2, %c0_3] : memref<128x128xf32, #tpu.memory_space<vmem>>, vector<128x128xf32>
    %cst = arith.constant dense<0.000000e+00> : vector<16x128xf32>
    %3 = tpu.matmul %1, %2, %cst {dimension_numbers = #tpu.dot_dimension_numbers<[1], [0], [0], [1], [0, 0, 1, 1], [], []>} : vector<16x128xf32>, vector<128x128xf32>, vector<16x128xf32> -> vector<16x128xf32>
    %c0_4 = arith.constant 0 : index
    %c0_5 = arith.constant 0 : index
    %4 = vector.load %arg4[%c0_4, %c0_5] : memref<32x16xf32, #tpu.memory_space<vmem>>, vector<32x16xf32>
    %cst_6 = arith.constant dense<0.000000e+00> : vector<32x128xf32>
    %5 = tpu.matmul %4, %3, %cst_6 {dimension_numbers = #tpu.dot_dimension_numbers<[1], [0], [0], [1], [0, 0, 1, 1], [], []>} : vector<32x16xf32>, vector<16x128xf32>, vector<32x128xf32> -> vector<32x128xf32>
    %c0_7 = arith.constant 0 : index
    %c0_8 = arith.constant 0 : index
    %6 = vector.load %arg5[%c0_7, %c0_8] : memref<1x128xf32, #tpu.memory_space<vmem>>, vector<1x128xf32>
    %7 = vector.broadcast %6 : vector<1x128xf32> to vector<32x128xf32>
    %8 = arith.addf %5, %7 : vector<32x128xf32>
    %c0_9 = arith.constant 0 : index
    %c0_10 = arith.constant 0 : index
    %c0_11 = arith.constant 0 : index
    %9 = vector.load %arg2[%c0_9, %c0_10, %c0_11] : memref<1x32x128xf32, #tpu.memory_space<vmem>>, vector<1x32x128xf32>
    %10 = vector.shape_cast %9 : vector<1x32x128xf32> to vector<32x128xf32>
    %c0_12 = arith.constant 0 : index
    %c0_13 = arith.constant 0 : index
    %c0_14 = arith.constant 0 : index
    %11 = vector.load %arg6[%c0_12, %c0_13, %c0_14] : memref<3x128x256xf32, #tpu.memory_space<vmem>>, vector<1x128x256xf32>
    %12 = vector.shape_cast %11 : vector<1x128x256xf32> to vector<128x256xf32>
    %cst_15 = arith.constant dense<0.000000e+00> : vector<32x256xf32>
    %13 = tpu.matmul %10, %12, %cst_15 {dimension_numbers = #tpu.dot_dimension_numbers<[1], [0], [0], [1], [0, 0, 1, 1], [], []>} : vector<32x128xf32>, vector<128x256xf32>, vector<32x256xf32> -> vector<32x256xf32>
    %c1 = arith.constant 1 : index
    %c0_16 = arith.constant 0 : index
    %c0_17 = arith.constant 0 : index
    %14 = vector.load %arg6[%c1, %c0_16, %c0_17] : memref<3x128x256xf32, #tpu.memory_space<vmem>>, vector<1x128x256xf32>
    %15 = vector.shape_cast %14 : vector<1x128x256xf32> to vector<128x256xf32>
    %cst_18 = arith.constant dense<0.000000e+00> : vector<32x256xf32>
    %16 = tpu.matmul %10, %15, %cst_18 {dimension_numbers = #tpu.dot_dimension_numbers<[1], [0], [0], [1], [0, 0, 1, 1], [], []>} : vector<32x128xf32>, vector<128x256xf32>, vector<32x256xf32> -> vector<32x256xf32>
    %c2 = arith.constant 2 : index
    %c0_19 = arith.constant 0 : index
    %c0_20 = arith.constant 0 : index
    %17 = vector.load %arg6[%c2, %c0_19, %c0_20] : memref<3x128x256xf32, #tpu.memory_space<vmem>>, vector<1x128x256xf32>
    %18 = vector.shape_cast %17 : vector<1x128x256xf32> to vector<128x256xf32>
    %cst_21 = arith.constant dense<0.000000e+00> : vector<32x256xf32>
    %19 = tpu.matmul %10, %18, %cst_21 {dimension_numbers = #tpu.dot_dimension_numbers<[1], [0], [0], [1], [0, 0, 1, 1], [], []>} : vector<32x128xf32>, vector<128x256xf32>, vector<32x256xf32> -> vector<32x256xf32>
    %cst_22 = arith.constant 0.000000e+00 : f32
    %20 = vector.broadcast %cst_22 : f32 to vector<1x256xf32>
    %21 = vector.extract_strided_slice %13 {offsets = [0, 0], sizes = [31, 256], strides = [1, 1]} : vector<32x256xf32> to vector<31x256xf32>
    %22 = tpu.concatenate %20, %21 in 0 : vector<1x256xf32>, vector<31x256xf32> -> vector<32x256xf32>
    %23 = arith.addf %22, %16 : vector<32x256xf32>
    %24 = vector.extract_strided_slice %19 {offsets = [1, 0], sizes = [31, 256], strides = [1, 1]} : vector<32x256xf32> to vector<31x256xf32>
    %25 = tpu.concatenate %24, %20 in 0 : vector<31x256xf32>, vector<1x256xf32> -> vector<32x256xf32>
    %26 = arith.addf %23, %25 : vector<32x256xf32>
    %c0_23 = arith.constant 0 : index
    %c0_24 = arith.constant 0 : index
    %c0_25 = arith.constant 0 : index
    %27 = vector.load %arg7[%c0_23, %c0_24, %c0_25] : memref<3x128x256xf32, #tpu.memory_space<vmem>>, vector<1x128x256xf32>
    %28 = vector.shape_cast %27 : vector<1x128x256xf32> to vector<128x256xf32>
    %cst_26 = arith.constant dense<0.000000e+00> : vector<32x256xf32>
    %29 = tpu.matmul %8, %28, %cst_26 {dimension_numbers = #tpu.dot_dimension_numbers<[1], [0], [0], [1], [0, 0, 1, 1], [], []>} : vector<32x128xf32>, vector<128x256xf32>, vector<32x256xf32> -> vector<32x256xf32>
    %c1_27 = arith.constant 1 : index
    %c0_28 = arith.constant 0 : index
    %c0_29 = arith.constant 0 : index
    %30 = vector.load %arg7[%c1_27, %c0_28, %c0_29] : memref<3x128x256xf32, #tpu.memory_space<vmem>>, vector<1x128x256xf32>
    %31 = vector.shape_cast %30 : vector<1x128x256xf32> to vector<128x256xf32>
    %cst_30 = arith.constant dense<0.000000e+00> : vector<32x256xf32>
    %32 = tpu.matmul %8, %31, %cst_30 {dimension_numbers = #tpu.dot_dimension_numbers<[1], [0], [0], [1], [0, 0, 1, 1], [], []>} : vector<32x128xf32>, vector<128x256xf32>, vector<32x256xf32> -> vector<32x256xf32>
    %c2_31 = arith.constant 2 : index
    %c0_32 = arith.constant 0 : index
    %c0_33 = arith.constant 0 : index
    %33 = vector.load %arg7[%c2_31, %c0_32, %c0_33] : memref<3x128x256xf32, #tpu.memory_space<vmem>>, vector<1x128x256xf32>
    %34 = vector.shape_cast %33 : vector<1x128x256xf32> to vector<128x256xf32>
    %cst_34 = arith.constant dense<0.000000e+00> : vector<32x256xf32>
    %35 = tpu.matmul %8, %34, %cst_34 {dimension_numbers = #tpu.dot_dimension_numbers<[1], [0], [0], [1], [0, 0, 1, 1], [], []>} : vector<32x128xf32>, vector<128x256xf32>, vector<32x256xf32> -> vector<32x256xf32>
    %cst_35 = arith.constant 0.000000e+00 : f32
    %36 = vector.broadcast %cst_35 : f32 to vector<1x256xf32>
    %37 = vector.extract_strided_slice %29 {offsets = [0, 0], sizes = [31, 256], strides = [1, 1]} : vector<32x256xf32> to vector<31x256xf32>
    %38 = tpu.concatenate %36, %37 in 0 : vector<1x256xf32>, vector<31x256xf32> -> vector<32x256xf32>
    %39 = arith.addf %38, %32 : vector<32x256xf32>
    %40 = vector.extract_strided_slice %35 {offsets = [1, 0], sizes = [31, 256], strides = [1, 1]} : vector<32x256xf32> to vector<31x256xf32>
    %41 = tpu.concatenate %40, %36 in 0 : vector<31x256xf32>, vector<1x256xf32> -> vector<32x256xf32>
    %42 = arith.addf %39, %41 : vector<32x256xf32>
    %43 = arith.addf %26, %42 : vector<32x256xf32>
    %c0_36 = arith.constant 0 : index
    %c0_37 = arith.constant 0 : index
    %44 = vector.load %arg8[%c0_36, %c0_37] : memref<1x256xf32, #tpu.memory_space<vmem>>, vector<1x256xf32>
    %45 = vector.broadcast %44 : vector<1x256xf32> to vector<32x256xf32>
    %46 = arith.addf %43, %45 : vector<32x256xf32>
    %cst_38 = arith.constant 0.000000e+00 : f32
    %47 = vector.broadcast %cst_38 : f32 to vector<32x256xf32>
    %48 = arith.maximumf %46, %47 : vector<32x256xf32>
    %c0_39 = arith.constant 0 : index
    %c0_40 = arith.constant 0 : index
    %c0_41 = arith.constant 0 : index
    %49 = vector.load %arg9[%c0_39, %c0_40, %c0_41] : memref<3x256x256xf32, #tpu.memory_space<vmem>>, vector<1x256x256xf32>
    %50 = vector.shape_cast %49 : vector<1x256x256xf32> to vector<256x256xf32>
    %cst_42 = arith.constant dense<0.000000e+00> : vector<32x256xf32>
    %51 = tpu.matmul %48, %50, %cst_42 {dimension_numbers = #tpu.dot_dimension_numbers<[1], [0], [0], [1], [0, 0, 1, 1], [], []>} : vector<32x256xf32>, vector<256x256xf32>, vector<32x256xf32> -> vector<32x256xf32>
    %c1_43 = arith.constant 1 : index
    %c0_44 = arith.constant 0 : index
    %c0_45 = arith.constant 0 : index
    %52 = vector.load %arg9[%c1_43, %c0_44, %c0_45] : memref<3x256x256xf32, #tpu.memory_space<vmem>>, vector<1x256x256xf32>
    %53 = vector.shape_cast %52 : vector<1x256x256xf32> to vector<256x256xf32>
    %cst_46 = arith.constant dense<0.000000e+00> : vector<32x256xf32>
    %54 = tpu.matmul %48, %53, %cst_46 {dimension_numbers = #tpu.dot_dimension_numbers<[1], [0], [0], [1], [0, 0, 1, 1], [], []>} : vector<32x256xf32>, vector<256x256xf32>, vector<32x256xf32> -> vector<32x256xf32>
    %c2_47 = arith.constant 2 : index
    %c0_48 = arith.constant 0 : index
    %c0_49 = arith.constant 0 : index
    %55 = vector.load %arg9[%c2_47, %c0_48, %c0_49] : memref<3x256x256xf32, #tpu.memory_space<vmem>>, vector<1x256x256xf32>
    %56 = vector.shape_cast %55 : vector<1x256x256xf32> to vector<256x256xf32>
    %cst_50 = arith.constant dense<0.000000e+00> : vector<32x256xf32>
    %57 = tpu.matmul %48, %56, %cst_50 {dimension_numbers = #tpu.dot_dimension_numbers<[1], [0], [0], [1], [0, 0, 1, 1], [], []>} : vector<32x256xf32>, vector<256x256xf32>, vector<32x256xf32> -> vector<32x256xf32>
    %cst_51 = arith.constant 0.000000e+00 : f32
    %58 = vector.broadcast %cst_51 : f32 to vector<1x256xf32>
    %59 = vector.extract_strided_slice %51 {offsets = [0, 0], sizes = [31, 256], strides = [1, 1]} : vector<32x256xf32> to vector<31x256xf32>
    %60 = tpu.concatenate %58, %59 in 0 : vector<1x256xf32>, vector<31x256xf32> -> vector<32x256xf32>
    %61 = arith.addf %60, %54 : vector<32x256xf32>
    %62 = vector.extract_strided_slice %57 {offsets = [1, 0], sizes = [31, 256], strides = [1, 1]} : vector<32x256xf32> to vector<31x256xf32>
    %63 = tpu.concatenate %62, %58 in 0 : vector<31x256xf32>, vector<1x256xf32> -> vector<32x256xf32>
    %64 = arith.addf %61, %63 : vector<32x256xf32>
    %c0_52 = arith.constant 0 : index
    %c0_53 = arith.constant 0 : index
    %65 = vector.load %arg10[%c0_52, %c0_53] : memref<1x256xf32, #tpu.memory_space<vmem>>, vector<1x256xf32>
    %66 = vector.broadcast %65 : vector<1x256xf32> to vector<32x256xf32>
    %67 = arith.addf %64, %66 : vector<32x256xf32>
    %cst_54 = arith.constant 0.000000e+00 : f32
    %68 = vector.broadcast %cst_54 : f32 to vector<32x256xf32>
    %69 = arith.maximumf %67, %68 : vector<32x256xf32>
    %70 = vector.shape_cast %69 : vector<32x256xf32> to vector<1x32x256xf32>
    %c0_55 = arith.constant 0 : index
    %c0_56 = arith.constant 0 : index
    %c0_57 = arith.constant 0 : index
    %71 = vector.load %arg11[%c0_55, %c0_56, %c0_57] : memref<1x32x256xf32, #tpu.memory_space<vmem>>, vector<1x32x256xf32>
    tpu.vector_store %arg11[%c0_55, %c0_56, %c0_57], %70 {strides = array<i32>} : memref<1x32x256xf32, #tpu.memory_space<vmem>>, vector<1x32x256xf32>,
    return
  }
  func.func @transform_0(%arg0: i32) -> (i32, i32, i32) {
    %c0_i32 = arith.constant 0 : i32
    %c0_i32_0 = arith.constant 0 : i32
    %c0_i32_1 = arith.constant 0 : i32
    return %arg0, %c0_i32, %c0_i32_0 : i32, i32, i32
  }
  func.func @transform_1(%arg0: i32) -> (i32, i32, i32) {
    %c0_i32 = arith.constant 0 : i32
    %c0_i32_0 = arith.constant 0 : i32
    %c0_i32_1 = arith.constant 0 : i32
    return %arg0, %c0_i32, %c0_i32_0 : i32, i32, i32
  }
  func.func @transform_2(%arg0: i32) -> (i32, i32) {
    %c0_i32 = arith.constant 0 : i32
    %c0_i32_0 = arith.constant 0 : i32
    %c0_i32_1 = arith.constant 0 : i32
    return %c0_i32, %c0_i32_0 : i32, i32
  }
  func.func @transform_3(%arg0: i32) -> (i32, i32) {
    %c0_i32 = arith.constant 0 : i32
    %c0_i32_0 = arith.constant 0 : i32
    %c0_i32_1 = arith.constant 0 : i32
    return %c0_i32, %c0_i32_0 : i32, i32
  }
  func.func @transform_4(%arg0: i32) -> (i32, i32) {
    %c0_i32 = arith.constant 0 : i32
    %c0_i32_0 = arith.constant 0 : i32
    %c0_i32_1 = arith.constant 0 : i32
    return %c0_i32, %c0_i32_0 : i32, i32
  }
  func.func @transform_5(%arg0: i32) -> (i32, i32, i32) {
    %c0_i32 = arith.constant 0 : i32
    %c0_i32_0 = arith.constant 0 : i32
    %c0_i32_1 = arith.constant 0 : i32
    %c0_i32_2 = arith.constant 0 : i32
    return %c0_i32, %c0_i32_0, %c0_i32_1 : i32, i32, i32
  }
  func.func @transform_6(%arg0: i32) -> (i32, i32, i32) {
    %c0_i32 = arith.constant 0 : i32
    %c0_i32_0 = arith.constant 0 : i32
    %c0_i32_1 = arith.constant 0 : i32
    %c0_i32_2 = arith.constant 0 : i32
    return %c0_i32, %c0_i32_0, %c0_i32_1 : i32, i32, i32
  }
  func.func @transform_7(%arg0: i32) -> (i32, i32) {
    %c0_i32 = arith.constant 0 : i32
    %c0_i32_0 = arith.constant 0 : i32
    %c0_i32_1 = arith.constant 0 : i32
    return %c0_i32, %c0_i32_0 : i32, i32
  }
  func.func @transform_8(%arg0: i32) -> (i32, i32, i32) {
    %c0_i32 = arith.constant 0 : i32
    %c0_i32_0 = arith.constant 0 : i32
    %c0_i32_1 = arith.constant 0 : i32
    %c0_i32_2 = arith.constant 0 : i32
    return %c0_i32, %c0_i32_0, %c0_i32_1 : i32, i32, i32
  }
  func.func @transform_9(%arg0: i32) -> (i32, i32) {
    %c0_i32 = arith.constant 0 : i32
    %c0_i32_0 = arith.constant 0 : i32
    %c0_i32_1 = arith.constant 0 : i32
    return %c0_i32, %c0_i32_0 : i32, i32
  }
  func.func @transform_10(%arg0: i32) -> (i32, i32, i32) {
    %c0_i32 = arith.constant 0 : i32
    %c0_i32_0 = arith.constant 0 : i32
    %c0_i32_1 = arith.constant 0 : i32
    return %arg0, %c0_i32, %c0_i32_0 : i32, i32, i32
  }
}

</mosaic_0001>

<bundles_post_ra>
// kernel: tile.18
= control target key start
LH: loop header
LB: loop body
LE: loop exit
PB: predicated region body
PF: predicated region fallthrough
CT: control target
= control target key end

     0   :  { %s40_s0 = inlined_call_operand.vmem [shape: f32[8], index: 0, kind: input, shape index: {}]   ;;  %s41_s1 = inlined_call_operand.vmem [shape: f32[32,8], index: 1, kind: output, shape index: {}]  }
   0x1   :  { %v4_v0 = vld [vmem:[%s40_s0] ss:$0 sm:$0xff] }
   0x2   :  { %5 = vst [vmem:[%s41_s1] sm:$0xff] %v4_v0  ;;  %12 = vst [vmem:[%s41_s1 + $0x8] sm:$0xff] %v4_v0 }
   0x3   :  { %13 = vst [vmem:[%s41_s1 + $0x10] sm:$0xff] %v4_v0  ;;  %14 = vst [vmem:[%s41_s1 + $0x18] sm:$0xff] %v4_v0 }

// kernel: tile.19
= control target key start
LH: loop header
LB: loop body
LE: loop exit
PB: predicated region body
PF: predicated region fallthrough
CT: control target
= control target key end

     0   :  { %s7_s6 = smov 3  ;;  %s21_s9 = smov 3  ;;  %vm4_vm0 = vcmask 64512   ;;  %vm11_vm1 = vcmask 1048512   ;;  %vm18_vm2 = vcmask 982912   ;;  %vm25_vm3 = vcmask 917312   ;;  %s235_s0 = inlined_call_operand.vmem [shape: f32[32,8], index: 0, kind: input, shape index: {}]   ;;  %s236_s1 = inlined_call_operand.vmem [shape: f32[1,256], index: 1, kind: output, shape index: {}]  }
   0x1   :  { %v125_v0 = vld [vmem:[%s235_s0 + $0xf] ss:$16 sm:%s7_s6]   ;;  %s156_s10 = smov 120   ;;  %v127_v1 = vld [vmem:[%s235_s0 + $0xd] ss:$16 sm:%s21_s9]   ;;  %s14_s13 = smov 3 }
   0x2   :  { %9 = vrot.lane.b32.xlu0 %v125_v0, %s156_s10  ;;  %s157_s14 = smov 104   ;;  %v126_v2 = vld [vmem:[%s235_s0 + $0xe] ss:$16 sm:%s14_s13]   ;;  %s28_s17 = smov 3  ;;  %vm32_vm4 = vcmask 851712   ;;  %vm39_vm5 = vcmask 786112  }
   0x3   :  { %23 = vrot.lane.b32.xlu1 %v127_v1, %s157_s14  ;;  %v128_v3 = vld [vmem:[%s235_s0 + $0xc] ss:$16 sm:%s28_s17]   ;;  %s35_s20 = smov 3  ;;  %s42_s21 = smov 3  ;;  %vm46_vm6 = vcmask 720512   ;;  %vm53_vm7 = vcmask 654912  }
   0x4   :  { %s158_s22 = smov 112   ;;  %s159_s23 = smov 96   ;;  %v129_v4 = vld [vmem:[%s235_s0 + $0xb] ss:$16 sm:%s35_s20]   ;;  %v130_v5 = vld [vmem:[%s235_s0 + $0xa] ss:$16 sm:%s42_s21]  }
   0x5   :  { %s49_s28 = smov 3  ;;  %s56_s29 = smov 3  ;;  %vm60_vm8 = vcmask 589312   ;;  %vm67_vm9 = vcmask 523712   ;;  %vm74_vm10 = vcmask 458112   ;;  %vm81_vm11 = vcmask 392512  }
   0x6   :  { %16 = vrot.lane.b32.xlu0 %v126_v2, %s158_s22  ;;  %s160_s30 = smov 88   ;;  %s161_s2 = smov 80   ;;  %v131_v6 = vld [vmem:[%s235_s0 + $0x9] ss:$16 sm:%s49_s28]   ;;  %vm88_vm12 = vcmask 326912   ;;  %vm95_vm13 = vcmask 261312  }
   0x7   :  { %30 = vrot.lane.b32.xlu1 %v128_v3, %s159_s23  ;;  %v132_v7 = vld [vmem:[%s235_s0 + $0x8] ss:$16 sm:%s56_s29]   ;;  %s63_s7 = smov 3  ;;  %s70_s8 = smov 3  ;;  %vm102_vm14 = vcmask 195712   ;;  %vm109_vm15 = vcmask 130112  }
   0x8   :  { %s162_s9 = smov 72   ;;  %s163_s10 = smov 64   ;;  %v133_v8 = vld [vmem:[%s235_s0 + $0x7] ss:$16 sm:%s63_s7]   ;;  %v134_v9 = vld [vmem:[%s235_s0 + $0x6] ss:$16 sm:%s70_s8]  }
   0x9   :  { %s2_s13 = smov 3  ;;  %s77_s16 = smov 3 }
   0xa   :  { %37 = vrot.lane.b32.xlu0 %v129_v4, %s160_s30  ;;  %v3_v10 = vld [vmem:[%s235_s0] ss:$16 sm:%s2_s13]   ;;  %s84_s19 = smov 3  ;;  %s164_s20 = smov 56  }
   0xb   :  { %44 = vrot.lane.b32.xlu1 %v130_v5, %s161_s2  ;;  %5 = vst.msk [vmem:[#allocation0] ss:$8 sm:$0x3] %vm4_vm0, %v3_v10   ;;  %s165_s21 = smov 48   ;;  %v135_v11 = vld [vmem:[%s235_s0 + $0x5] ss:$16 sm:%s77_s16]  }
   0xc   :  { %v136_v12 = vld [vmem:[%s235_s0 + $0x4] ss:$16 sm:%s84_s19]   ;;  %s91_s26 = smov 3  ;;  %s98_s27 = smov 3 }
   0xd   :  { %s166_s28 = smov 40   ;;  %s167_s29 = smov 32   ;;  %v137_v13 = vld [vmem:[%s235_s0 + $0x3] ss:$16 sm:%s91_s26]   ;;  %v138_v14 = vld [vmem:[%s235_s0 + $0x2] ss:$16 sm:%s98_s27]  }
   0xe   :  { %51 = vrot.lane.b32.xlu0 %v131_v6, %s162_s9  ;;  %s105_s5 = smov 3  ;;  %s168_s6 = smov 24  }
   0xf   :  { %58 = vrot.lane.b32.xlu1 %v132_v7, %s163_s10  ;;  %s169_s7 = smov 16   ;;  %v139_v15 = vld [vmem:[%s235_s0 + $0x1] ss:$16 sm:%s105_s5]   ;;  %s170_s0 = smov 8  }
  0x12   :  { %65 = vrot.lane.b32.xlu0 %v133_v8, %s164_s20 }
  0x13   :  { %72 = vrot.lane.b32.xlu1 %v134_v9, %s165_s21 }
  0x16   :  { %79 = vrot.lane.b32.xlu0 %v135_v11, %s166_s28 }
  0x17   :  { %86 = vrot.lane.b32.xlu1 %v136_v12, %s167_s29 }
  0x1a   :  { %93 = vrot.lane.b32.xlu0 %v137_v13, %s168_s6 }
  0x1b   :  { %100 = vrot.lane.b32.xlu1 %v138_v14, %s169_s7 }
  0x1e   :  { %107 = vrot.lane.b32.xlu0 %v139_v15, %s170_s0 }
  0x74   :  { %v10_v16 = vpop.permute.xlu0 %9  }
  0x75   :  { %12 = vst.msk [vmem:[#allocation0] ss:$8 sm:$0x3] %vm11_vm1, %v10_v16   ;;  %v24_v17 = vpop.permute.xlu1 %23  }
  0x78   :  { %v17_v18 = vpop.permute.xlu0 %16  }
  0x79   :  { %19 = vst.msk [vmem:[#allocation0] ss:$8 sm:$0x3] %vm18_vm2, %v17_v18   ;;  %v31_v19 = vpop.permute.xlu1 %30  }
  0x7a   :  { %26 = vst.msk [vmem:[#allocation0] ss:$8 sm:$0x3] %vm25_vm3, %v24_v17  }
  0x7b   :  { %33 = vst.msk [vmem:[#allocation0] ss:$8 sm:$0x3] %vm32_vm4, %v31_v19  }
  0x7c   :  { %v38_v20 = vpop.permute.xlu0 %37  }
  0x7d   :  { %40 = vst.msk [vmem:[#allocation0] ss:$8 sm:$0x3] %vm39_vm5, %v38_v20   ;;  %v45_v21 = vpop.permute.xlu1 %44  }
  0x7e   :  { %47 = vst.msk [vmem:[#allocation0] ss:$8 sm:$0x3] %vm46_vm6, %v45_v21  }
  0x80   :  { %v52_v22 = vpop.permute.xlu0 %51  }
  0x81   :  { %54 = vst.msk [vmem:[#allocation0] ss:$8 sm:$0x3] %vm53_vm7, %v52_v22   ;;  %v59_v23 = vpop.permute.xlu1 %58  }
  0x82   :  { %61 = vst.msk [vmem:[#allocation0] ss:$8 sm:$0x3] %vm60_vm8, %v59_v23  }
  0x84   :  { %v66_v24 = vpop.permute.xlu0 %65  }
  0x85   :  { %68 = vst.msk [vmem:[#allocation0] ss:$8 sm:$0x3] %vm67_vm9, %v66_v24   ;;  %v73_v25 = vpop.permute.xlu1 %72  }
  0x86   :  { %75 = vst.msk [vmem:[#allocation0] ss:$8 sm:$0x3] %vm74_vm10, %v73_v25  }
  0x88   :  { %v80_v26 = vpop.permute.xlu0 %79  }
  0x89   :  { %82 = vst.msk [vmem:[#allocation0] ss:$8 sm:$0x3] %vm81_vm11, %v80_v26   ;;  %v87_v27 = vpop.permute.xlu1 %86  }
  0x8a   :  { %89 = vst.msk [vmem:[#allocation0] ss:$8 sm:$0x3] %vm88_vm12, %v87_v27  }
  0x8c   :  { %v94_v28 = vpop.permute.xlu0 %93  }
  0x8d   :  { %96 = vst.msk [vmem:[#allocation0] ss:$8 sm:$0x3] %vm95_vm13, %v94_v28   ;;  %v101_v29 = vpop.permute.xlu1 %100  }
  0x8e   :  { %103 = vst.msk [vmem:[#allocation0] ss:$8 sm:$0x3] %vm102_vm14, %v101_v29  }
  0x90   :  { %v108_v30 = vpop.permute.xlu0 %107  }
  0x91   :  { %110 = vst.msk [vmem:[#allocation0] ss:$8 sm:$0x3] %vm109_vm15, %v108_v30  }
  0x98   :  { %v115_v31 = vld [vmem:[#allocation0] sm:$0x1]  ;;  %v120_v32 = vld [vmem:[#allocation0 + $0x8] sm:$0x1] }
  0x99   :  { %118 = vst [vmem:[%s236_s1] sm:$0x1] %v115_v31  ;;  %140 = vst [vmem:[%s236_s1 + $0x1] sm:$0x1] %v120_v32 }

// kernel: tile.14
= control target key start
LH: loop header
LB: loop body
LE: loop exit
PB: predicated region body
PF: predicated region fallthrough
CT: control target
= control target key end

     0   :  { %s40_s0 = inlined_call_operand.vmem [shape: f32[4], index: 0, kind: input, shape index: {}]   ;;  %s41_s1 = inlined_call_operand.vmem [shape: f32[32,4], index: 1, kind: output, shape index: {}]  }
   0x1   :  { %v4_v0 = vld [vmem:[%s40_s0] ss:$0 sm:$0xff] }
   0x2   :  { %5 = vst [vmem:[%s41_s1] sm:$0xff] %v4_v0  ;;  %12 = vst [vmem:[%s41_s1 + $0x8] sm:$0xff] %v4_v0 }
   0x3   :  { %13 = vst [vmem:[%s41_s1 + $0x10] sm:$0xff] %v4_v0  ;;  %14 = vst [vmem:[%s41_s1 + $0x18] sm:$0xff] %v4_v0 }

// kernel: tile.15
= control target key start
LH: loop header
LB: loop body
LE: loop exit
PB: predicated region body
PF: predicated region fallthrough
CT: control target
= control target key end

     0   :  { %s261_s10 = smov 124   ;;  %s262_s11 = smov 116   ;;  %vm3_vm0 = vcmask 31744   ;;  %vm9_vm1 = vcmask 1048544   ;;  %vm15_vm2 = vcmask 1015744   ;;  %vm21_vm3 = vcmask 982944   ;;  %s401_s0 = inlined_call_operand.vmem [shape: f32[32,4], index: 0, kind: input, shape index: {}]   ;;  %s402_s1 = inlined_call_operand.vmem [shape: f32[1,128], index: 1, kind: output, shape index: {}]  }
   0x1   :  { %v199_v0 = vld [vmem:[%s401_s0 + $0x1f] sm:$0x1]   ;;  %v201_v1 = vld [vmem:[%s401_s0 + $0x1d] sm:$0x1]   ;;  %v200_v2 = vld [vmem:[%s401_s0 + $0x1e] sm:$0x1]  }
   0x2   :  { %7 = vrot.lane.b32.xlu0 %v199_v0, %s261_s10  ;;  %19 = vrot.lane.b32.xlu1 %v201_v1, %s262_s11  ;;  %v202_v3 = vld [vmem:[%s401_s0 + $0x1c] sm:$0x1]   ;;  %s263_s16 = smov 120   ;;  %s264_s17 = smov 112   ;;  %v203_v4 = vld [vmem:[%s401_s0 + $0x1b] sm:$0x1]  }
   0x3   :  { %v204_v5 = vld [vmem:[%s401_s0 + $0x1a] sm:$0x1]   ;;  %s265_s22 = smov 108   ;;  %s266_s23 = smov 104   ;;  %v205_v6 = vld [vmem:[%s401_s0 + $0x19] sm:$0x1]  }
   0x4   :  { %v206_v7 = vld [vmem:[%s401_s0 + $0x18] sm:$0x1]   ;;  %s267_s28 = smov 100   ;;  %s268_s29 = smov 96   ;;  %v207_v8 = vld [vmem:[%s401_s0 + $0x17] sm:$0x1]  }
   0x5   :  { %v208_v9 = vld [vmem:[%s401_s0 + $0x16] sm:$0x1]   ;;  %v2_v10 = vld [vmem:[%s401_s0] sm:$0x1]   ;;  %s269_s7 = smov 92   ;;  %s270_s8 = smov 88  }
   0x6   :  { %13 = vrot.lane.b32.xlu0 %v200_v2, %s263_s16  ;;  %25 = vrot.lane.b32.xlu1 %v202_v3, %s264_s17  ;;  %4 = vst.msk [vmem:[#allocation0] sm:$0x1] %vm3_vm0, %v2_v10   ;;  %v209_v11 = vld [vmem:[%s401_s0 + $0x15] sm:$0x1]   ;;  %v210_v12 = vld [vmem:[%s401_s0 + $0x14] sm:$0x1]  }
   0x7   :  { %s271_s13 = smov 84   ;;  %s272_s14 = smov 80   ;;  %v211_v13 = vld [vmem:[%s401_s0 + $0x13] sm:$0x1]   ;;  %v212_v14 = vld [vmem:[%s401_s0 + $0x12] sm:$0x1]  }
   0x8   :  { %s273_s19 = smov 76   ;;  %s274_s20 = smov 72   ;;  %v213_v15 = vld [vmem:[%s401_s0 + $0x11] sm:$0x1]   ;;  %v214_v16 = vld [vmem:[%s401_s0 + $0x10] sm:$0x1]  }
   0x9   :  { %s275_s25 = smov 68   ;;  %s276_s26 = smov 64   ;;  %v215_v17 = vld [vmem:[%s401_s0 + $0xf] sm:$0x1]   ;;  %v216_v18 = vld [vmem:[%s401_s0 + $0xe] sm:$0x1]  }
   0xa   :  { %31 = vrot.lane.b32.xlu0 %v203_v4, %s265_s22  ;;  %37 = vrot.lane.b32.xlu1 %v204_v5, %s266_s23  ;;  %s277_s2 = smov 60   ;;  %s278_s3 = smov 56   ;;  %v217_v19 = vld [vmem:[%s401_s0 + $0xd] sm:$0x1]   ;;  %v218_v20 = vld [vmem:[%s401_s0 + $0xc] sm:$0x1]  }
   0xb   :  { %s280_s9 = smov 48   ;;  %v219_v21 = vld [vmem:[%s401_s0 + $0xb] sm:$0x1]   ;;  %v220_v22 = vld [vmem:[%s401_s0 + $0xa] sm:$0x1]   ;;  %s282_s15 = smov 40  }
   0xc   :  { %v221_v23 = vld [vmem:[%s401_s0 + $0x9] sm:$0x1]   ;;  %v222_v24 = vld [vmem:[%s401_s0 + $0x8] sm:$0x1]   ;;  %s284_s21 = smov 32   ;;  %s286_s27 = smov 24  }
   0xd   :  { %v223_v25 = vld [vmem:[%s401_s0 + $0x7] sm:$0x1]   ;;  %v224_v26 = vld [vmem:[%s401_s0 + $0x6] sm:$0x1]   ;;  %v225_v27 = vld [vmem:[%s401_s0 + $0x5] sm:$0x1]  }
   0xe   :  { %43 = vrot.lane.b32.xlu0 %v205_v6, %s267_s28  ;;  %49 = vrot.lane.b32.xlu1 %v206_v7, %s268_s29  ;;  %v226_v28 = vld [vmem:[%s401_s0 + $0x4] sm:$0x1]   ;;  %s288_s4 = smov 16   ;;  %v227_v29 = vld [vmem:[%s401_s0 + $0x3] sm:$0x1]   ;;  %s290_s10 = smov 8  }
   0xf   :  { %v228_v30 = vld [vmem:[%s401_s0 + $0x2] sm:$0x1]   ;;  %v229_v31 = vld [vmem:[%s401_s0 + $0x1] sm:$0x1]   ;;  %s291_s0 = smov 4   ;;  %vm27_vm4 = vcmask 950144  }
  0x10   :  { %vm33_vm5 = vcmask 917344   ;;  %vm39_vm6 = vcmask 884544   ;;  %vm45_vm7 = vcmask 851744   ;;  %vm51_vm8 = vcmask 818944  }
  0x11   :  { %vm57_vm9 = vcmask 786144   ;;  %vm63_vm10 = vcmask 753344   ;;  %vm69_vm11 = vcmask 720544   ;;  %vm75_vm12 = vcmask 687744  }
  0x12   :  { %55 = vrot.lane.b32.xlu0 %v207_v8, %s269_s7  ;;  %61 = vrot.lane.b32.xlu1 %v208_v9, %s270_s8  ;;  %s279_s8 = smov 52   ;;  %vm81_vm13 = vcmask 654944   ;;  %vm87_vm14 = vcmask 622144   ;;  %vm93_vm15 = vcmask 589344   ;;  %vm99_vm0 = vcmask 556544  }
  0x16   :  { %67 = vrot.lane.b32.xlu0 %v209_v11, %s271_s13  ;;  %73 = vrot.lane.b32.xlu1 %v210_v12, %s272_s14  ;;  %s281_s14 = smov 44  }
  0x1a   :  { %79 = vrot.lane.b32.xlu0 %v211_v13, %s273_s19  ;;  %85 = vrot.lane.b32.xlu1 %v212_v14, %s274_s20  ;;  %s283_s20 = smov 36  }
  0x1e   :  { %91 = vrot.lane.b32.xlu0 %v213_v15, %s275_s25  ;;  %97 = vrot.lane.b32.xlu1 %v214_v16, %s276_s26  ;;  %s285_s26 = smov 28  }
  0x22   :  { %103 = vrot.lane.b32.xlu0 %v215_v17, %s277_s2  ;;  %109 = vrot.lane.b32.xlu1 %v216_v18, %s278_s3  ;;  %s287_s3 = smov 20  }
  0x26   :  { %115 = vrot.lane.b32.xlu0 %v217_v19, %s279_s8  ;;  %121 = vrot.lane.b32.xlu1 %v218_v20, %s280_s9  ;;  %s289_s9 = smov 12  }
  0x2a   :  { %127 = vrot.lane.b32.xlu0 %v219_v21, %s281_s14  ;;  %133 = vrot.lane.b32.xlu1 %v220_v22, %s282_s15 }
  0x2e   :  { %139 = vrot.lane.b32.xlu0 %v221_v23, %s283_s20  ;;  %145 = vrot.lane.b32.xlu1 %v222_v24, %s284_s21 }
  0x32   :  { %151 = vrot.lane.b32.xlu0 %v223_v25, %s285_s26  ;;  %157 = vrot.lane.b32.xlu1 %v224_v26, %s286_s27 }
  0x36   :  { %163 = vrot.lane.b32.xlu0 %v225_v27, %s287_s3  ;;  %169 = vrot.lane.b32.xlu1 %v226_v28, %s288_s4 }
  0x3a   :  { %175 = vrot.lane.b32.xlu0 %v227_v29, %s289_s9  ;;  %181 = vrot.lane.b32.xlu1 %v228_v30, %s290_s10 }
  0x3e   :  { %187 = vrot.lane.b32.xlu0 %v229_v31, %s291_s0 }
  0x74   :  { %v8_v32 = vpop.permute.xlu0 %7   ;;  %v20_v33 = vpop.permute.xlu1 %19  }
  0x75   :  { %10 = vst.msk [vmem:[#allocation0] sm:$0x1] %vm9_vm1, %v8_v32   ;;  %vm105_vm1 = vcmask 523744  }
  0x78   :  { %v14_v34 = vpop.permute.xlu0 %13   ;;  %v26_v35 = vpop.permute.xlu1 %25  }
  0x79   :  { %16 = vst.msk [vmem:[#allocation0] sm:$0x1] %vm15_vm2, %v14_v34   ;;  %vm111_vm2 = vcmask 490944  }
  0x7a   :  { %22 = vst.msk [vmem:[#allocation0] sm:$0x1] %vm21_vm3, %v20_v33   ;;  %vm117_vm3 = vcmask 458144  }
  0x7b   :  { %28 = vst.msk [vmem:[#allocation0] sm:$0x1] %vm27_vm4, %v26_v35   ;;  %vm123_vm4 = vcmask 425344  }
  0x7c   :  { %v32_v36 = vpop.permute.xlu0 %31   ;;  %v38_v37 = vpop.permute.xlu1 %37  }
  0x7d   :  { %34 = vst.msk [vmem:[#allocation0] sm:$0x1] %vm33_vm5, %v32_v36   ;;  %vm129_vm5 = vcmask 392544  }
  0x7e   :  { %40 = vst.msk [vmem:[#allocation0] sm:$0x1] %vm39_vm6, %v38_v37   ;;  %vm135_vm6 = vcmask 359744  }
  0x80   :  { %v44_v38 = vpop.permute.xlu0 %43   ;;  %v50_v39 = vpop.permute.xlu1 %49  }
  0x81   :  { %46 = vst.msk [vmem:[#allocation0] sm:$0x1] %vm45_vm7, %v44_v38   ;;  %vm141_vm7 = vcmask 326944  }
  0x82   :  { %52 = vst.msk [vmem:[#allocation0] sm:$0x1] %vm51_vm8, %v50_v39   ;;  %vm147_vm8 = vcmask 294144  }
  0x84   :  { %v56_v40 = vpop.permute.xlu0 %55   ;;  %v62_v41 = vpop.permute.xlu1 %61  }
  0x85   :  { %58 = vst.msk [vmem:[#allocation0] sm:$0x1] %vm57_vm9, %v56_v40   ;;  %vm153_vm9 = vcmask 261344  }
  0x86   :  { %64 = vst.msk [vmem:[#allocation0] sm:$0x1] %vm63_vm10, %v62_v41   ;;  %vm159_vm10 = vcmask 228544  }
  0x88   :  { %v68_v42 = vpop.permute.xlu0 %67   ;;  %v74_v43 = vpop.permute.xlu1 %73  }
  0x89   :  { %70 = vst.msk [vmem:[#allocation0] sm:$0x1] %vm69_vm11, %v68_v42   ;;  %vm165_vm11 = vcmask 195744  }
  0x8a   :  { %76 = vst.msk [vmem:[#allocation0] sm:$0x1] %vm75_vm12, %v74_v43   ;;  %vm171_vm12 = vcmask 162944  }
  0x8c   :  { %v80_v44 = vpop.permute.xlu0 %79   ;;  %v86_v45 = vpop.permute.xlu1 %85  }
  0x8d   :  { %82 = vst.msk [vmem:[#allocation0] sm:$0x1] %vm81_vm13, %v80_v44   ;;  %vm177_vm13 = vcmask 130144  }
  0x8e   :  { %88 = vst.msk [vmem:[#allocation0] sm:$0x1] %vm87_vm14, %v86_v45   ;;  %vm183_vm14 = vcmask 97344  }
  0x90   :  { %v92_v46 = vpop.permute.xlu0 %91   ;;  %v98_v47 = vpop.permute.xlu1 %97  }
  0x91   :  { %94 = vst.msk [vmem:[#allocation0] sm:$0x1] %vm93_vm15, %v92_v46   ;;  %vm189_vm15 = vcmask 64544  }
  0x92   :  { %100 = vst.msk [vmem:[#allocation0] sm:$0x1] %vm99_vm0, %v98_v47  }
  0x94   :  { %v104_v48 = vpop.permute.xlu0 %103   ;;  %v110_v49 = vpop.permute.xlu1 %109  }
  0x95   :  { %106 = vst.msk [vmem:[#allocation0] sm:$0x1] %vm105_vm1, %v104_v48  }
  0x96   :  { %112 = vst.msk [vmem:[#allocation0] sm:$0x1] %vm111_vm2, %v110_v49  }
  0x98   :  { %v116_v50 = vpop.permute.xlu0 %115   ;;  %v122_v51 = vpop.permute.xlu1 %121  }
  0x99   :  { %118 = vst.msk [vmem:[#allocation0] sm:$0x1] %vm117_vm3, %v116_v50  }
  0x9a   :  { %124 = vst.msk [vmem:[#allocation0] sm:$0x1] %vm123_vm4, %v122_v51  }
  0x9c   :  { %v128_v52 = vpop.permute.xlu0 %127   ;;  %v134_v53 = vpop.permute.xlu1 %133  }
  0x9d   :  { %130 = vst.msk [vmem:[#allocation0] sm:$0x1] %vm129_vm5, %v128_v52  }
  0x9e   :  { %136 = vst.msk [vmem:[#allocation0] sm:$0x1] %vm135_vm6, %v134_v53  }
  0xa0   :  { %v140_v54 = vpop.permute.xlu0 %139   ;;  %v146_v55 = vpop.permute.xlu1 %145  }
  0xa1   :  { %142 = vst.msk [vmem:[#allocation0] sm:$0x1] %vm141_vm7, %v140_v54  }
  0xa2   :  { %148 = vst.msk [vmem:[#allocation0] sm:$0x1] %vm147_vm8, %v146_v55  }
  0xa4   :  { %v152_v56 = vpop.permute.xlu0 %151   ;;  %v158_v57 = vpop.permute.xlu1 %157  }
  0xa5   :  { %154 = vst.msk [vmem:[#allocation0] sm:$0x1] %vm153_vm9, %v152_v56  }
  0xa6   :  { %160 = vst.msk [vmem:[#allocation0] sm:$0x1] %vm159_vm10, %v158_v57  }
  0xa8   :  { %v164_v58 = vpop.permute.xlu0 %163   ;;  %v170_v59 = vpop.permute.xlu1 %169  }
  0xa9   :  { %166 = vst.msk [vmem:[#allocation0] sm:$0x1] %vm165_vm11, %v164_v58  }
  0xaa   :  { %172 = vst.msk [vmem:[#allocation0] sm:$0x1] %vm171_vm12, %v170_v59  }
  0xac   :  { %v176_v60 = vpop.permute.xlu0 %175   ;;  %v182_v61 = vpop.permute.xlu1 %181  }
  0xad   :  { %178 = vst.msk [vmem:[#allocation0] sm:$0x1] %vm177_vm13, %v176_v60  }
  0xae   :  { %184 = vst.msk [vmem:[#allocation0] sm:$0x1] %vm183_vm14, %v182_v61  }
  0xb0   :  { %v188_v62 = vpop.permute.xlu0 %187  }
  0xb1   :  { %190 = vst.msk [vmem:[#allocation0] sm:$0x1] %vm189_vm15, %v188_v62  }
  0xb8   :  { %v195_v63 = vld [vmem:[#allocation0] sm:$0x1] }
  0xb9   :  { %198 = vst [vmem:[%s402_s1] sm:$0x1] %v195_v63 }

// kernel: _lambda_.1
= control target key start
LH: loop header
LB: loop body
LE: loop exit
PB: predicated region body
PF: predicated region fallthrough
CT: control target
= control target key end

     0   :  { %s2577_s13 = smov 0   ;;  %s4090_s0 = inlined_call_operand.vmem [shape: f32[2,16,128], index: 0, kind: input, shape index: {}]   ;;  %s4091_s1 = inlined_call_operand.vmem [shape: f32[2,32,128], index: 1, kind: input, shape index: {}]   ;;  %s4092_s2 = inlined_call_operand.vmem [shape: f32[128,128], index: 2, kind: input, shape index: {}]   ;;  %s4093_s3 = inlined_call_operand.vmem [shape: f32[32,16], index: 3, kind: input, shape index: {}]   ;;  %s4094_s4 = inlined_call_operand.vmem [shape: f32[1,128], index: 4, kind: input, shape index: {}]   ;;  %s4095_s5 = inlined_call_operand.vmem [shape: f32[3,128,256], index: 5, kind: input, shape index: {}]   ;;  %s4096_s6 = inlined_call_operand.vmem [shape: f32[3,128,256], index: 6, kind: input, shape index: {}]   ;;  %s4097_s7 = inlined_call_operand.vmem [shape: f32[1,256], index: 7, kind: input, shape index: {}]   ;;  %s4098_s8 = inlined_call_operand.vmem [shape: f32[3,256,256], index: 8, kind: input, shape index: {}]   ;;  %s4099_s9 = inlined_call_operand.vmem [shape: f32[1,256], index: 9, kind: input, shape index: {}]   ;;  %s4100_s10 = inlined_call_operand.vmem [shape: f32[2,32,256], index: 10, kind: output, shape index: {}]  }
   0x1 LB: > { %s2158_s14 = sadd.s32 4294967295, %s2519_s13   ;;  %p2162_p0 = scmp.ge.s32.totalorder %s2519_s13, 1  ;;  %s2519_s13 = sphi %s2577_s13, %s20_s13  }
   0x2   : > { %p322_p1 = scmp.lt.s32.totalorder %s2519_s13, 3 }
   0x4   : > { %p323_p2 = pnand %p2162_p0, %p322_p1 }
   0x5   : > { %p365_p3 = scmp.lt.s32.totalorder (!%p323_p2), %s2158_s14, 1 }
   0x6   : > { %326 = sbr.rel (%p323_p2) target bundleno = 965 (0x3c5), region = 60 }
   0xb   : > { %v397_v0 = vld [vmem:[%s4092_s2 + $0x78] sm:$0xff]  ;;  %v396_v1 = vld [vmem:[%s4092_s2 + $0x70] sm:$0xff]  ;;  %v395_v2 = vld [vmem:[%s4092_s2 + $0x68] sm:$0xff]  ;;  %s4102_s14 = smov (!%p365_p3, %s2158_s14), 1  ;;  %vm484_vm0 = vcmask 130048   ;;  %v2521_v23 = vmov 0.0  }
   0xc   : > { %2459 = vmatprep.subr.mxu0 %v397_v0  ;;  %v394_v3 = vld [vmem:[%s4092_s2 + $0x60] sm:$0xff]  ;;  %s2432_s23 = sshll.u32 %s4102_s14, 4  ;;  %v393_v4 = vld [vmem:[%s4092_s2 + $0x58] sm:$0xff]  ;;  %v392_v6 = vld [vmem:[%s4092_s2 + $0x50] sm:$0xff]  ;;  %682 = vmatprep.mubr.f32.mxu1 %v2521_v23  ;;  %s2433_s18 = sshll.u32 %s4102_s14, 5  ;;  %vm959_vm1 = vcmask 1040384  }
   0xd   : > { %2460 = vmatpush3.msra.mxu0 %v397_v0  ;;  %s2603_s26 = scalar_lea.vmem %s4090_s0, %s2432_s23  ;;  %v391_v7 = vld [vmem:[%s4092_s2 + $0x48] sm:$0xff]  ;;  %v390_v8 = vld [vmem:[%s4092_s2 + $0x40] sm:$0xff]  ;;  %v389_v9 = vld [vmem:[%s4092_s2 + $0x38] sm:$0xff]  ;;  %s2742_s27 = scalar_lea.vmem %s4091_s1, %s2433_s18  ;;  %vm1000_vm2 = vcmask 1046528  }
   0xe   : > { %2461 = vmatprep.subr.mxu0 %v396_v1  ;;  %v380_v5 = vld [vmem:[%s2603_s26] sm:$0xff]  ;;  %v388_v10 = vld [vmem:[%s4092_s2 + $0x30] sm:$0xff]  ;;  %v387_v11 = vld [vmem:[%s4092_s2 + $0x28] sm:$0xff] }
   0xf   : > { %2462 = vmatpush3.msra.mxu0 %v396_v1  ;;  %2491 = vmatprep.mubr.f32.mxu0 %v380_v5  ;;  %v386_v12 = vld [vmem:[%s4092_s2 + $0x20] sm:$0xff]  ;;  %v385_v13 = vld [vmem:[%s4092_s2 + $0x18] sm:$0xff]  ;;  %v384_v14 = vld [vmem:[%s4092_s2 + $0x10] sm:$0xff] }
  0x10   : > { %2463 = vmatprep.subr.mxu0 %v395_v2  ;;  %v383_v15 = vld [vmem:[%s4092_s2 + $0x8] sm:$0xff]  ;;  %v382_v16 = vld [vmem:[%s4092_s2] sm:$0xff]  ;;  %v617_v19 = vld [vmem:[%s4095_s5 + $0xf8] sm:$0xff] }
  0x11   : > { %2464 = vmatpush3.msra.mxu0 %v395_v2  ;;  %v381_v17 = vld [vmem:[%s2603_s26 + $0x8] sm:$0xff]  ;;  %v473_v18 = vld [vmem:[%s4093_s3] sm:$0xff]  ;;  %v616_v20 = vld [vmem:[%s4095_s5 + $0xf0] sm:$0xff]  ;;  %618 = vmatprep.subr.mxu1 %v617_v19 }
  0x12   : > { %2465 = vmatprep.subr.mxu0 %v394_v3  ;;  %v615_v21 = vld [vmem:[%s4095_s5 + $0xe8] sm:$0xff]  ;;  %v614_v22 = vld [vmem:[%s4095_s5 + $0xe0] sm:$0xff]  ;;  %619 = vmatpush1.msra.mxu1 %v616_v20  ;;  %v613_v24 = vld [vmem:[%s4095_s5 + $0xd8] sm:$0xff] }
  0x13   : > { %2466 = vmatpush3.msra.mxu0 %v394_v3  ;;  %620 = vmatprep.subr.mxu1 %v615_v21  ;;  %v612_v25 = vld [vmem:[%s4095_s5 + $0xd0] sm:$0xff]  ;;  %v611_v26 = vld [vmem:[%s4095_s5 + $0xc8] sm:$0xff]  ;;  %v610_v27 = vld [vmem:[%s4095_s5 + $0xc0] sm:$0xff] }
  0x14   : > { %2467 = vmatprep.subr.mxu0 %v393_v4  ;;  %621 = vmatpush1.msra.mxu1 %v614_v22  ;;  %v609_v28 = vld [vmem:[%s4095_s5 + $0xb8] sm:$0xff]  ;;  %v608_v29 = vld [vmem:[%s4095_s5 + $0xb0] sm:$0xff]  ;;  %v607_v30 = vld [vmem:[%s4095_s5 + $0xa8] sm:$0xff] }
  0x15   : > { %2468 = vmatpush3.msra.mxu0 %v393_v4  ;;  %622 = vmatprep.subr.mxu1 %v613_v24  ;;  %v606_v31 = vld [vmem:[%s4095_s5 + $0xa0] sm:$0xff]  ;;  %v605_v32 = vld [vmem:[%s4095_s5 + $0x98] sm:$0xff]  ;;  %v604_v33 = vld [vmem:[%s4095_s5 + $0x90] sm:$0xff] }
  0x16   : > { %2469 = vmatprep.subr.mxu0 %v392_v6  ;;  %623 = vmatpush1.msra.mxu1 %v612_v25  ;;  %v603_v34 = vld [vmem:[%s4095_s5 + $0x88] sm:$0xff]  ;;  %v602_v35 = vld [vmem:[%s4095_s5 + $0x80] sm:$0xff]  ;;  %v601_v36 = vld [vmem:[%s4095_s5 + $0x78] sm:$0xff] }
  0x17   : > { %2470 = vmatpush3.msra.mxu0 %v392_v6  ;;  %624 = vmatprep.subr.mxu1 %v611_v26  ;;  %v600_v37 = vld [vmem:[%s4095_s5 + $0x70] sm:$0xff]  ;;  %v599_v38 = vld [vmem:[%s4095_s5 + $0x68] sm:$0xff]  ;;  %v598_v39 = vld [vmem:[%s4095_s5 + $0x60] sm:$0xff] }
  0x18   : > { %2471 = vmatprep.subr.mxu0 %v391_v7  ;;  %625 = vmatpush1.msra.mxu1 %v610_v27  ;;  %v597_v40 = vld [vmem:[%s4095_s5 + $0x58] sm:$0xff]  ;;  %v596_v41 = vld [vmem:[%s4095_s5 + $0x50] sm:$0xff]  ;;  %v595_v42 = vld [vmem:[%s4095_s5 + $0x48] sm:$0xff] }
  0x19   : > { %2472 = vmatpush3.msra.mxu0 %v391_v7  ;;  %626 = vmatprep.subr.mxu1 %v609_v28  ;;  %v594_v43 = vld [vmem:[%s4095_s5 + $0x40] sm:$0xff]  ;;  %v593_v44 = vld [vmem:[%s4095_s5 + $0x38] sm:$0xff]  ;;  %v592_v45 = vld [vmem:[%s4095_s5 + $0x30] sm:$0xff] }
  0x1a   : > { %2473 = vmatprep.subr.mxu0 %v390_v8  ;;  %627 = vmatpush1.msra.mxu1 %v608_v29  ;;  %v591_v46 = vld [vmem:[%s4095_s5 + $0x28] sm:$0xff]  ;;  %v590_v47 = vld [vmem:[%s4095_s5 + $0x20] sm:$0xff]  ;;  %v589_v48 = vld [vmem:[%s4095_s5 + $0x18] sm:$0xff] }
  0x1b   : > { %2474 = vmatpush3.msra.mxu0 %v390_v8  ;;  %628 = vmatprep.subr.mxu1 %v607_v30  ;;  %v588_v49 = vld [vmem:[%s4095_s5 + $0x10] sm:$0xff]  ;;  %v587_v50 = vld [vmem:[%s4095_s5 + $0x8] sm:$0xff]  ;;  %v586_v51 = vld [vmem:[%s4095_s5] sm:$0xff] }
  0x1c   : > { %2475 = vmatprep.subr.mxu0 %v389_v9  ;;  %629 = vmatpush1.msra.mxu1 %v606_v31  ;;  %v2237_v52 = vld [vmem:[%s4095_s5 + $0x2f8] sm:$0xff]  ;;  %v2754_v53 = vld [vmem:[%s2742_s27] sm:$0xff]  ;;  %v2236_v54 = vld [vmem:[%s4095_s5 + $0x2f0] sm:$0xff] }
  0x1d   : > { %2476 = vmatpush3.msra.mxu0 %v389_v9  ;;  %630 = vmatprep.subr.mxu1 %v605_v32  ;;  %v2235_v55 = vld [vmem:[%s4095_s5 + $0x2e8] sm:$0xff]  ;;  %v2234_v56 = vld [vmem:[%s4095_s5 + $0x2e0] sm:$0xff]  ;;  %v2233_v57 = vld [vmem:[%s4095_s5 + $0x2d8] sm:$0xff] }
  0x1e   : > { %2477 = vmatprep.subr.mxu0 %v388_v10  ;;  %631 = vmatpush1.msra.mxu1 %v604_v33  ;;  %v2771_v58 = vld [vmem:[%s2742_s27 + $0x8] sm:$0xff]  ;;  %v2232_v59 = vld [vmem:[%s4095_s5 + $0x2d0] sm:$0xff]  ;;  %v2230_v61 = vld [vmem:[%s4095_s5 + $0x2c0] sm:$0xff] }
  0x1f   : > { %2478 = vmatpush3.msra.mxu0 %v388_v10  ;;  %632 = vmatprep.subr.mxu1 %v603_v34  ;;  %v2231_v60 = vld [vmem:[%s4095_s5 + $0x2c8] sm:$0xff]  ;;  %v2229_v62 = vld [vmem:[%s4095_s5 + $0x2b8] sm:$0xff]  ;;  %v2788_v63 = vld [vmem:[%s2742_s27 + $0x10] sm:$0xff] }
  0x20   : > { %2479 = vmatprep.subr.mxu0 %v387_v11  ;;  %633 = vmatpush1.msra.mxu1 %v602_v35  ;;  %v2228_v0 = vld [vmem:[%s4095_s5 + $0x2b0] sm:$0xff]  ;;  %v2227_v1 = vld [vmem:[%s4095_s5 + $0x2a8] sm:$0xff]  ;;  %v2226_v2 = vld [vmem:[%s4095_s5 + $0x2a0] sm:$0xff] }
  0x21   : > { %2480 = vmatpush3.msra.mxu0 %v387_v11  ;;  %634 = vmatprep.subr.mxu1 %v601_v36  ;;  %v2225_v3 = vld [vmem:[%s4095_s5 + $0x298] sm:$0xff]  ;;  %v2224_v5 = vld [vmem:[%s4095_s5 + $0x290] sm:$0xff]  ;;  %v2223_v6 = vld [vmem:[%s4095_s5 + $0x288] sm:$0xff] }
  0x22   : > { %2481 = vmatprep.subr.mxu0 %v386_v12  ;;  %635 = vmatpush1.msra.mxu1 %v600_v37  ;;  %v2805_v4 = vld [vmem:[%s2742_s27 + $0x18] sm:$0xff]  ;;  %v2222_v7 = vld [vmem:[%s4095_s5 + $0x280] sm:$0xff]  ;;  %v2220_v9 = vld [vmem:[%s4095_s5 + $0x270] sm:$0xff]  ;;  %s2434_s27 = sshll.u32 %s4102_s14, 6 }
  0x23   : > { %2482 = vmatpush3.msra.mxu0 %v386_v12  ;;  %636 = vmatprep.subr.mxu1 %v599_v38  ;;  %v2221_v8 = vld [vmem:[%s4095_s5 + $0x278] sm:$0xff]  ;;  %v2219_v10 = vld [vmem:[%s4095_s5 + $0x268] sm:$0xff]  ;;  %v2218_v11 = vld [vmem:[%s4095_s5 + $0x260] sm:$0xff]  ;;  %s4069_s11 = scalar_lea.vmem %s4100_s10, %s2434_s27 }
  0x24   : > { %2483 = vmatprep.subr.mxu0 %v385_v13  ;;  %637 = vmatpush1.msra.mxu1 %v598_v39  ;;  %v2217_v12 = vld [vmem:[%s4095_s5 + $0x258] sm:$0xff]  ;;  %v2210_v19 = vld [vmem:[%s4095_s5 + $0x220] sm:$0xff]  ;;  %v2208_v21 = vld [vmem:[%s4095_s5 + $0x210] sm:$0xff] }
  0x25   : > { %2484 = vmatpush3.msra.mxu0 %v385_v13  ;;  %638 = vmatprep.subr.mxu1 %v597_v40  ;;  %v2216_v13 = vld [vmem:[%s4095_s5 + $0x250] sm:$0xff]  ;;  %v2209_v20 = vld [vmem:[%s4095_s5 + $0x218] sm:$0xff]  ;;  %v2207_v22 = vld [vmem:[%s4095_s5 + $0x208] sm:$0xff] }
  0x26   : > { %2485 = vmatprep.subr.mxu0 %v384_v14  ;;  %639 = vmatpush1.msra.mxu1 %v596_v41  ;;  %v2206_v24 = vld [vmem:[%s4095_s5 + $0x200] sm:$0xff]  ;;  %v2269_v25 = vld [vmem:[%s4096_s6 + $0x1f8] sm:$0xff]  ;;  %v2268_v26 = vld [vmem:[%s4096_s6 + $0x1f0] sm:$0xff] }
  0x27   : > { %2486 = vmatpush3.msra.mxu0 %v384_v14  ;;  %640 = vmatprep.subr.mxu1 %v595_v42  ;;  %v2215_v14 = vld [vmem:[%s4095_s5 + $0x248] sm:$0xff]  ;;  %v2266_v28 = vld [vmem:[%s4096_s6 + $0x1e0] sm:$0xff]  ;;  %v2265_v29 = vld [vmem:[%s4096_s6 + $0x1d8] sm:$0xff] }
  0x28   : > { %2487 = vmatprep.subr.mxu0 %v383_v15  ;;  %641 = vmatpush1.msra.mxu1 %v594_v43  ;;  %v2267_v27 = vld [vmem:[%s4096_s6 + $0x1e8] sm:$0xff]  ;;  %v2264_v30 = vld [vmem:[%s4096_s6 + $0x1d0] sm:$0xff]  ;;  %v2262_v32 = vld [vmem:[%s4096_s6 + $0x1c0] sm:$0xff] }
  0x29   : > { %2488 = vmatpush3.msra.mxu0 %v383_v15  ;;  %642 = vmatprep.subr.mxu1 %v593_v44  ;;  %v2214_v15 = vld [vmem:[%s4095_s5 + $0x240] sm:$0xff]  ;;  %v2263_v31 = vld [vmem:[%s4096_s6 + $0x1c8] sm:$0xff]  ;;  %v2261_v33 = vld [vmem:[%s4096_s6 + $0x1b8] sm:$0xff] }
  0x2a   : > { %2489 = vmatprep.subr.mxu0 %v382_v16  ;;  %643 = vmatpush1.msra.mxu1 %v592_v45  ;;  %v2260_v34 = vld [vmem:[%s4096_s6 + $0x1b0] sm:$0xff]  ;;  %v2259_v35 = vld [vmem:[%s4096_s6 + $0x1a8] sm:$0xff]  ;;  %v2258_v36 = vld [vmem:[%s4096_s6 + $0x1a0] sm:$0xff] }
  0x2b   : > { %2490 = vmatpush3.msra.mxu0 %v382_v16  ;;  %644 = vmatprep.subr.mxu1 %v591_v46  ;;  %v2213_v16 = vld [vmem:[%s4095_s5 + $0x238] sm:$0xff]  ;;  %v2256_v38 = vld [vmem:[%s4096_s6 + $0x190] sm:$0xff]  ;;  %v2255_v39 = vld [vmem:[%s4096_s6 + $0x188] sm:$0xff] }
  0x2c   : > { %2492 = vmatmul.mubr.f32.vlgmr.msra.gmra.mxu0 %v381_v17  ;;  %645 = vmatpush1.msra.mxu1 %v590_v47  ;;  %v2212_v17 = vld [vmem:[%s4095_s5 + $0x230] sm:$0xff]  ;;  %v2257_v37 = vld [vmem:[%s4096_s6 + $0x198] sm:$0xff]  ;;  %v2254_v40 = vld [vmem:[%s4096_s6 + $0x180] sm:$0xff] }
  0x2d   : > { %2498 = vmatprep.mubr.msk.f32.mxu0 %vm484_vm0, %v473_v18  ;;  %646 = vmatprep.subr.mxu1 %v589_v48  ;;  %v2211_v18 = vld [vmem:[%s4095_s5 + $0x228] sm:$0xff]  ;;  %v2253_v41 = vld [vmem:[%s4096_s6 + $0x178] sm:$0xff]  ;;  %v2252_v42 = vld [vmem:[%s4096_s6 + $0x170] sm:$0xff] }
  0x2e   : > { %647 = vmatpush1.msra.mxu1 %v588_v49  ;;  %v2251_v43 = vld [vmem:[%s4096_s6 + $0x168] sm:$0xff]  ;;  %v2250_v44 = vld [vmem:[%s4096_s6 + $0x160] sm:$0xff]  ;;  %v2249_v45 = vld [vmem:[%s4096_s6 + $0x158] sm:$0xff] }
  0x2f   : > { %648 = vmatprep.subr.mxu1 %v587_v50  ;;  %v2248_v46 = vld [vmem:[%s4096_s6 + $0x150] sm:$0xff]  ;;  %v2247_v47 = vld [vmem:[%s4096_s6 + $0x148] sm:$0xff]  ;;  %v2246_v48 = vld [vmem:[%s4096_s6 + $0x140] sm:$0xff] }
  0x30   : > { %649 = vmatpush1.msra.mxu1 %v586_v51  ;;  %v2245_v49 = vld [vmem:[%s4096_s6 + $0x138] sm:$0xff]  ;;  %v2244_v50 = vld [vmem:[%s4096_s6 + $0x130] sm:$0xff]  ;;  %v2243_v51 = vld [vmem:[%s4096_s6 + $0x128] sm:$0xff] }
  0x31   : > { %862 = vmatprep.subr.mxu1 %v2237_v52  ;;  %683 = vmatmul.mubr.f32.vlgmr.msra.gmra.mxu1 %v2754_v53 }
  0x32   : > { %863 = vmatpush1.msra.mxu1 %v2236_v54  ;;  %688 = vmatprep.mubr.f32.mxu1 %v2521_v23 }
  0x33   : > { %864 = vmatprep.subr.mxu1 %v2235_v55  ;;  %v474_v55 = vld [vmem:[%s4093_s3 + $0x8] sm:$0xff] }
  0x34   : > { %865 = vmatpush1.msra.mxu1 %v2234_v56  ;;  %v2205_v56 = vld [vmem:[%s4095_s5 + $0x1f8] sm:$0xff] }
  0x35   : > { %866 = vmatprep.subr.mxu1 %v2233_v57  ;;  %689 = vmatmul.mubr.f32.gmra.mxu1 %v2771_v58  ;;  %v475_v57 = vld [vmem:[%s4093_s3 + $0x10] sm:$0xff] }
  0x36   : > { %867 = vmatpush1.msra.mxu1 %v2232_v59  ;;  %694 = vmatprep.mubr.f32.mxu1 %v2521_v23  ;;  %v2204_v59 = vld [vmem:[%s4095_s5 + $0x1f0] sm:$0xff] }
  0x37   : > { %868 = vmatprep.subr.mxu1 %v2231_v60  ;;  %v2203_v60 = vld [vmem:[%s4095_s5 + $0x1e8] sm:$0xff] }
  0x38   : > { %869 = vmatpush1.msra.mxu1 %v2230_v61  ;;  %v2202_v61 = vld [vmem:[%s4095_s5 + $0x1e0] sm:$0xff] }
  0x39   : > { %870 = vmatprep.subr.mxu1 %v2229_v62  ;;  %695 = vmatmul.mubr.f32.gmra.mxu1 %v2788_v63  ;;  %v476_v62 = vld [vmem:[%s4093_s3 + $0x18] sm:$0xff] }
  0x3a   : > { %871 = vmatpush1.msra.mxu1 %v2228_v0  ;;  %700 = vmatprep.mubr.f32.mxu1 %v2521_v23  ;;  %v2201_v0 = vld [vmem:[%s4095_s5 + $0x1d8] sm:$0xff] }
  0x3b   : > { %872 = vmatprep.subr.mxu1 %v2227_v1  ;;  %v2200_v1 = vld [vmem:[%s4095_s5 + $0x1d0] sm:$0xff] }
  0x3c   : > { %873 = vmatpush1.msra.mxu1 %v2226_v2  ;;  %v2199_v2 = vld [vmem:[%s4095_s5 + $0x1c8] sm:$0xff] }
  0x3d   : > { %874 = vmatprep.subr.mxu1 %v2225_v3  ;;  %701 = vmatmul.mubr.f32.gmra.mxu1 %v2805_v4  ;;  %v2198_v3 = vld [vmem:[%s4095_s5 + $0x1c0] sm:$0xff] }
  0x3e   : > { %875 = vmatpush1.msra.mxu1 %v2224_v5  ;;  %926 = vmatprep.mubr.f32.mxu1 %v2521_v23  ;;  %v2197_v5 = vld [vmem:[%s4095_s5 + $0x1b8] sm:$0xff] }
  0x3f   : > { %876 = vmatprep.subr.mxu1 %v2223_v6  ;;  %v2196_v6 = vld [vmem:[%s4095_s5 + $0x1b0] sm:$0xff] }
  0x40   : > { %877 = vmatpush1.msra.mxu1 %v2222_v7  ;;  %v2195_v7 = vld [vmem:[%s4095_s5 + $0x1a8] sm:$0xff] }
  0x41   : > { %878 = vmatprep.subr.mxu1 %v2221_v8  ;;  %v2194_v8 = vld [vmem:[%s4095_s5 + $0x1a0] sm:$0xff] }
  0x42   : > { %879 = vmatpush1.msra.mxu1 %v2220_v9  ;;  %v2193_v9 = vld [vmem:[%s4095_s5 + $0x198] sm:$0xff] }
  0x43   : > { %880 = vmatprep.subr.mxu1 %v2219_v10  ;;  %v2192_v10 = vld [vmem:[%s4095_s5 + $0x190] sm:$0xff] }
  0x44   : > { %881 = vmatpush1.msra.mxu1 %v2218_v11  ;;  %v2191_v11 = vld [vmem:[%s4095_s5 + $0x188] sm:$0xff] }
  0x45   : > { %882 = vmatprep.subr.mxu1 %v2217_v12  ;;  %v2190_v12 = vld [vmem:[%s4095_s5 + $0x180] sm:$0xff] }
  0x46   : > { %883 = vmatpush1.msra.mxu1 %v2216_v13  ;;  %v2189_v13 = vld [vmem:[%s4095_s5 + $0x178] sm:$0xff] }
  0x47   : > { %884 = vmatprep.subr.mxu1 %v2215_v14  ;;  %v2188_v14 = vld [vmem:[%s4095_s5 + $0x170] sm:$0xff] }
  0x48   : > { %885 = vmatpush1.msra.mxu1 %v2214_v15  ;;  %v2187_v15 = vld [vmem:[%s4095_s5 + $0x168] sm:$0xff] }
  0x49   : > { %886 = vmatprep.subr.mxu1 %v2213_v16  ;;  %v2186_v16 = vld [vmem:[%s4095_s5 + $0x160] sm:$0xff] }
  0x4a   : > { %887 = vmatpush1.msra.mxu1 %v2212_v17  ;;  %v2185_v17 = vld [vmem:[%s4095_s5 + $0x158] sm:$0xff] }
  0x4b   : > { %888 = vmatprep.subr.mxu1 %v2211_v18  ;;  %v2184_v18 = vld [vmem:[%s4095_s5 + $0x150] sm:$0xff] }
  0x4c   : > { %889 = vmatpush1.msra.mxu1 %v2210_v19  ;;  %v2183_v19 = vld [vmem:[%s4095_s5 + $0x148] sm:$0xff] }
  0x4d   : > { %890 = vmatprep.subr.mxu1 %v2209_v20  ;;  %v2182_v20 = vld [vmem:[%s4095_s5 + $0x140] sm:$0xff] }
  0x4e   : > { %891 = vmatpush1.msra.mxu1 %v2208_v21  ;;  %v2181_v21 = vld [vmem:[%s4095_s5 + $0x138] sm:$0xff] }
  0x4f   : > { %892 = vmatprep.subr.mxu1 %v2207_v22  ;;  %v2180_v22 = vld [vmem:[%s4095_s5 + $0x130] sm:$0xff] }
  0x50   : > { %893 = vmatpush1.msra.mxu1 %v2206_v24  ;;  %v2179_v24 = vld [vmem:[%s4095_s5 + $0x128] sm:$0xff] }
  0x51   : > { %927 = vmatmul.mubr.f32.vlgmr.msra.gmra.mxu1 %v2754_v53  ;;  %1187 = vmatprep.subr.mxu1 %v2269_v25  ;;  %v2178_v25 = vld [vmem:[%s4095_s5 + $0x120] sm:$0xff] }
  0x52   : > { %932 = vmatprep.mubr.f32.mxu1 %v2521_v23  ;;  %1188 = vmatpush1.msra.mxu1 %v2268_v26  ;;  %v2177_v26 = vld [vmem:[%s4095_s5 + $0x118] sm:$0xff] }
  0x53   : > { %1189 = vmatprep.subr.mxu1 %v2267_v27  ;;  %v2176_v27 = vld [vmem:[%s4095_s5 + $0x110] sm:$0xff] }
  0x54   : > { %1190 = vmatpush1.msra.mxu1 %v2266_v28  ;;  %v2175_v28 = vld [vmem:[%s4095_s5 + $0x108] sm:$0xff] }
  0x55   : > { %933 = vmatmul.mubr.f32.gmra.mxu1 %v2771_v58  ;;  %1191 = vmatprep.subr.mxu1 %v2265_v29  ;;  %v2174_v29 = vld [vmem:[%s4095_s5 + $0x100] sm:$0xff] }
  0x56   : > { %938 = vmatprep.mubr.f32.mxu1 %v2521_v23  ;;  %1192 = vmatpush1.msra.mxu1 %v2264_v30  ;;  %v1064_v30 = vld [vmem:[%s4096_s6 + $0xf8] sm:$0xff] }
  0x57   : > { %1193 = vmatprep.subr.mxu1 %v2263_v31  ;;  %v1063_v31 = vld [vmem:[%s4096_s6 + $0xf0] sm:$0xff] }
  0x58   : > { %1194 = vmatpush1.msra.mxu1 %v2262_v32  ;;  %v1062_v32 = vld [vmem:[%s4096_s6 + $0xe8] sm:$0xff] }
  0x59   : > { %939 = vmatmul.mubr.f32.gmra.mxu1 %v2788_v63  ;;  %1195 = vmatprep.subr.mxu1 %v2261_v33  ;;  %v1061_v33 = vld [vmem:[%s4096_s6 + $0xe0] sm:$0xff] }
  0x5a   : > { %1196 = vmatpush1.msra.mxu1 %v2260_v34  ;;  %944 = vmatprep.mubr.f32.mxu1 %v2521_v23  ;;  %v1060_v34 = vld [vmem:[%s4096_s6 + $0xd8] sm:$0xff] }
  0x5b   : > { %1197 = vmatprep.subr.mxu1 %v2259_v35  ;;  %v1059_v35 = vld [vmem:[%s4096_s6 + $0xd0] sm:$0xff] }
  0x5c   : > { %1198 = vmatpush1.msra.mxu1 %v2258_v36  ;;  %v1057_v36 = vld [vmem:[%s4096_s6 + $0xc0] sm:$0xff] }
  0x5d   : > { %1199 = vmatprep.subr.mxu1 %v2257_v37  ;;  %945 = vmatmul.mubr.f32.gmra.mxu1 %v2805_v4  ;;  %v1056_v37 = vld [vmem:[%s4096_s6 + $0xb8] sm:$0xff] }
  0x5e   : > { %1200 = vmatpush1.msra.mxu1 %v2256_v38  ;;  %1251 = vmatprep.mubr.f32.mxu1 %v2521_v23  ;;  %v1055_v38 = vld [vmem:[%s4096_s6 + $0xb0] sm:$0xff] }
  0x5f   : > { %1201 = vmatprep.subr.mxu1 %v2255_v39  ;;  %v1054_v39 = vld [vmem:[%s4096_s6 + $0xa8] sm:$0xff] }
  0x60   : > { %1202 = vmatpush1.msra.mxu1 %v2254_v40  ;;  %v1052_v40 = vld [vmem:[%s4096_s6 + $0x98] sm:$0xff] }
  0x61   : > { %1203 = vmatprep.subr.mxu1 %v2253_v41  ;;  %v1051_v41 = vld [vmem:[%s4096_s6 + $0x90] sm:$0xff] }
  0x62   : > { %1204 = vmatpush1.msra.mxu1 %v2252_v42  ;;  %v1050_v42 = vld [vmem:[%s4096_s6 + $0x88] sm:$0xff] }
  0x63   : > { %1205 = vmatprep.subr.mxu1 %v2251_v43  ;;  %v1048_v43 = vld [vmem:[%s4096_s6 + $0x78] sm:$0xff] }
  0x64   : > { %1206 = vmatpush1.msra.mxu1 %v2250_v44  ;;  %v1047_v44 = vld [vmem:[%s4096_s6 + $0x70] sm:$0xff] }
  0x65   : > { %1207 = vmatprep.subr.mxu1 %v2249_v45  ;;  %v1046_v45 = vld [vmem:[%s4096_s6 + $0x68] sm:$0xff] }
  0x66   : > { %1208 = vmatpush1.msra.mxu1 %v2248_v46  ;;  %v1044_v46 = vld [vmem:[%s4096_s6 + $0x58] sm:$0xff] }
  0x67   : > { %1209 = vmatprep.subr.mxu1 %v2247_v47  ;;  %v1043_v47 = vld [vmem:[%s4096_s6 + $0x50] sm:$0xff] }
  0x68   : > { %1210 = vmatpush1.msra.mxu1 %v2246_v48  ;;  %v1042_v48 = vld [vmem:[%s4096_s6 + $0x48] sm:$0xff] }
  0x69   : > { %1211 = vmatprep.subr.mxu1 %v2245_v49  ;;  %v1041_v49 = vld [vmem:[%s4096_s6 + $0x40] sm:$0xff] }
  0x6a   : > { %1212 = vmatpush1.msra.mxu1 %v2244_v50  ;;  %v1040_v50 = vld [vmem:[%s4096_s6 + $0x38] sm:$0xff] }
  0x6b   : > { %1213 = vmatprep.subr.mxu1 %v2243_v51  ;;  %v1039_v51 = vld [vmem:[%s4096_s6 + $0x30] sm:$0xff] }
  0xec   : > { %v2493_v52 = vpop.f32.mrf.mxu0 }
  0xed   : > { %2494 = vmatprep.subr.mxu0 %v2493_v52 }
  0xee   : > { %v464_v54 = vpop.f32.mrf.mxu0  ;;  %2495 = vmatpush3.msra.mxu0 %v2493_v52  ;;  %v1038_v52 = vld [vmem:[%s4096_s6 + $0x28] sm:$0xff] }
  0xef   : > { %2496 = vmatprep.subr.mxu0 %v464_v54 }
  0xf0   : > { %2497 = vmatpush3.msra.mxu0 %v464_v54  ;;  %v1037_v54 = vld [vmem:[%s4096_s6 + $0x20] sm:$0xff] }
  0xf1   : > { %2499 = vmatmul.mubr.msk.f32.vlgmr.msra.gmra.mxu0 %vm484_vm0, %v474_v55  ;;  %740 = vmatprep.subr.mxu0 %v2205_v56  ;;  %v1036_v55 = vld [vmem:[%s4096_s6 + $0x18] sm:$0xff]  ;;  %v2242_v56 = vld [vmem:[%s4096_s6 + $0x120] sm:$0xff] }
  0xf2   : > { %2501 = vmatprep.mubr.msk.f32.mxu0 %vm484_vm0, %v475_v57  ;;  %741 = vmatpush1.msra.mxu0 %v2204_v59  ;;  %v1035_v57 = vld [vmem:[%s4096_s6 + $0x10] sm:$0xff]  ;;  %v2241_v59 = vld [vmem:[%s4096_s6 + $0x118] sm:$0xff] }
  0xf3   : > { %742 = vmatprep.subr.mxu0 %v2203_v60  ;;  %1214 = vmatpush1.msra.mxu1 %v2242_v56  ;;  %v1034_v60 = vld [vmem:[%s4096_s6 + $0x8] sm:$0xff]  ;;  %v2270_v56 = vld [vmem:[%s4096_s6 + $0x200] sm:$0xff] }
  0xf4   : > { %743 = vmatpush1.msra.mxu0 %v2202_v61  ;;  %1215 = vmatprep.subr.mxu1 %v2241_v59  ;;  %v2240_v61 = vld [vmem:[%s4096_s6 + $0x110] sm:$0xff] }
  0xf5   : > { %2502 = vmatmul.mubr.msk.f32.gmra.mxu0 %vm484_vm0, %v476_v62  ;;  %744 = vmatprep.subr.mxu0 %v2201_v0  ;;  %v1033_v62 = vld [vmem:[%s4096_s6] sm:$0xff]  ;;  %v2239_v0 = vld [vmem:[%s4096_s6 + $0x108] sm:$0xff]  ;;  %v2332_v59 = vld [vmem:[%s4098_s8 + $0x2f0] sm:$0xff] }
  0xf6   : > { %745 = vmatpush1.msra.mxu0 %v2200_v1  ;;  %804 = vmatprep.mubr.f32.mxu0 %v2521_v23  ;;  %v2238_v1 = vld [vmem:[%s4096_s6 + $0x100] sm:$0xff] }
  0xf7   : > { %746 = vmatprep.subr.mxu0 %v2199_v2  ;;  %1216 = vmatpush1.msra.mxu1 %v2240_v61  ;;  %v2301_v2 = vld [vmem:[%s4096_s6 + $0x2f8] sm:$0xff]  ;;  %v2330_v61 = vld [vmem:[%s4098_s8 + $0x2e0] sm:$0xff] }
  0xf8   : > { %747 = vmatpush1.msra.mxu0 %v2198_v3  ;;  %1217 = vmatprep.subr.mxu1 %v2239_v0  ;;  %v1545_v3 = vld [vmem:[%s4098_s8 + $0xf8] sm:$0xff]  ;;  %v2328_v0 = vld [vmem:[%s4098_s8 + $0x2d0] sm:$0xff] }
  0xf9   : > { %748 = vmatprep.subr.mxu0 %v2197_v5  ;;  %1218 = vmatpush1.msra.mxu1 %v2238_v1  ;;  %v2327_v1 = vld [vmem:[%s4098_s8 + $0x2c8] sm:$0xff] }
  0xfa   : > { %749 = vmatpush1.msra.mxu0 %v2196_v6  ;;  %1578 = vmatprep.subr.mxu1 %v1545_v3  ;;  %v2169_v6 = vld [vmem:[%s4094_s4] ss:$0 sm:$0xff]  ;;  %v2325_v3 = vld [vmem:[%s4098_s8 + $0x2b8] sm:$0xff] }
  0xfb   : > { %750 = vmatprep.subr.mxu0 %v2195_v7 }
  0xfc   : > { %751 = vmatpush1.msra.mxu0 %v2194_v8 }
  0xfd   : > { %752 = vmatprep.subr.mxu0 %v2193_v9  ;;  %v2300_v9 = vld [vmem:[%s4096_s6 + $0x2f0] sm:$0xff] }
  0xfe   : > { %753 = vmatpush1.msra.mxu0 %v2192_v10  ;;  %v2299_v10 = vld [vmem:[%s4096_s6 + $0x2e8] sm:$0xff] }
  0xff   : > { %754 = vmatprep.subr.mxu0 %v2191_v11 }
 0x100   : > { %755 = vmatpush1.msra.mxu0 %v2190_v12  ;;  %v2298_v12 = vld [vmem:[%s4096_s6 + $0x2e0] sm:$0xff] }
 0x101   : > { %756 = vmatprep.subr.mxu0 %v2189_v13  ;;  %v1544_v13 = vld [vmem:[%s4098_s8 + $0xf0] sm:$0xff] }
 0x102   : > { %757 = vmatpush1.msra.mxu0 %v2188_v14  ;;  %v2297_v14 = vld [vmem:[%s4096_s6 + $0x2d8] sm:$0xff] }
 0x103   : > { %758 = vmatprep.subr.mxu0 %v2187_v15 }
 0x104   : > { %759 = vmatpush1.msra.mxu0 %v2186_v16 }
 0x105   : > { %760 = vmatprep.subr.mxu0 %v2185_v17  ;;  %v2296_v17 = vld [vmem:[%s4096_s6 + $0x2d0] sm:$0xff] }
 0x106   : > { %761 = vmatpush1.msra.mxu0 %v2184_v18  ;;  %v2295_v18 = vld [vmem:[%s4096_s6 + $0x2c8] sm:$0xff] }
 0x107   : > { %762 = vmatprep.subr.mxu0 %v2183_v19 }
 0x108   : > { %763 = vmatpush1.msra.mxu0 %v2182_v20  ;;  %v2294_v20 = vld [vmem:[%s4096_s6 + $0x2c0] sm:$0xff] }
 0x109   : > { %764 = vmatprep.subr.mxu0 %v2181_v21  ;;  %v2293_v21 = vld [vmem:[%s4096_s6 + $0x2b8] sm:$0xff] }
 0x10a   : > { %765 = vmatpush1.msra.mxu0 %v2180_v22  ;;  %v2292_v22 = vld [vmem:[%s4096_s6 + $0x2b0] sm:$0xff] }
 0x10b   : > { %766 = vmatprep.subr.mxu0 %v2179_v24  ;;  %v2291_v24 = vld [vmem:[%s4096_s6 + $0x2a8] sm:$0xff] }
 0x10c   : > { %767 = vmatpush1.msra.mxu0 %v2178_v25 }
 0x10d   : > { %768 = vmatprep.subr.mxu0 %v2177_v26  ;;  %v2290_v26 = vld [vmem:[%s4096_s6 + $0x2a0] sm:$0xff] }
 0x10e   : > { %769 = vmatpush1.msra.mxu0 %v2176_v27  ;;  %v2289_v27 = vld [vmem:[%s4096_s6 + $0x298] sm:$0xff] }
 0x10f   : > { %770 = vmatprep.subr.mxu0 %v2175_v28  ;;  %v2288_v28 = vld [vmem:[%s4096_s6 + $0x290] sm:$0xff] }
 0x110   : > { %771 = vmatpush1.msra.mxu0 %v2174_v29  ;;  %v2287_v29 = vld [vmem:[%s4096_s6 + $0x288] sm:$0xff] }
 0x111   : > { %805 = vmatmul.mubr.f32.vlgmr.msra.gmra.mxu0 %v2754_v53  ;;  %1065 = vmatprep.subr.mxu0 %v1064_v30  ;;  %v1058_v53 = vld [vmem:[%s4096_s6 + $0xc8] sm:$0xff]  ;;  %v2286_v30 = vld [vmem:[%s4096_s6 + $0x280] sm:$0xff] }
 0x112   : > { %1066 = vmatpush1.msra.mxu0 %v1063_v31  ;;  %810 = vmatprep.mubr.f32.mxu0 %v2521_v23  ;;  %v1543_v31 = vld [vmem:[%s4098_s8 + $0xe8] sm:$0xff] }
 0x113   : > { %1067 = vmatprep.subr.mxu0 %v1062_v32  ;;  %v2285_v32 = vld [vmem:[%s4096_s6 + $0x278] sm:$0xff] }
 0x114   : > { %1068 = vmatpush1.msra.mxu0 %v1061_v33  ;;  %v1542_v33 = vld [vmem:[%s4098_s8 + $0xe0] sm:$0xff] }
 0x115   : > { %1069 = vmatprep.subr.mxu0 %v1060_v34  ;;  %811 = vmatmul.mubr.f32.gmra.mxu0 %v2771_v58  ;;  %v1053_v58 = vld [vmem:[%s4096_s6 + $0xa0] sm:$0xff]  ;;  %v2284_v34 = vld [vmem:[%s4096_s6 + $0x270] sm:$0xff] }
 0x116   : > { %1070 = vmatpush1.msra.mxu0 %v1059_v35  ;;  %816 = vmatprep.mubr.f32.mxu0 %v2521_v23  ;;  %v1541_v35 = vld [vmem:[%s4098_s8 + $0xd8] sm:$0xff] }
 0x117   : > { %1071 = vmatprep.subr.mxu0 %v1058_v53  ;;  %v2283_v53 = vld [vmem:[%s4096_s6 + $0x268] sm:$0xff] }
 0x118   : > { %1072 = vmatpush1.msra.mxu0 %v1057_v36  ;;  %v1540_v36 = vld [vmem:[%s4098_s8 + $0xd0] sm:$0xff] }
 0x119   : > { %1073 = vmatprep.subr.mxu0 %v1056_v37  ;;  %817 = vmatmul.mubr.f32.gmra.mxu0 %v2788_v63  ;;  %v1049_v63 = vld [vmem:[%s4096_s6 + $0x80] sm:$0xff] }
 0x11a   : > { %1074 = vmatpush1.msra.mxu0 %v1055_v38  ;;  %822 = vmatprep.mubr.f32.mxu0 %v2521_v23  ;;  %v2282_v37 = vld [vmem:[%s4096_s6 + $0x260] sm:$0xff]  ;;  %v1539_v38 = vld [vmem:[%s4098_s8 + $0xc8] sm:$0xff] }
 0x11b   : > { %1075 = vmatprep.subr.mxu0 %v1054_v39  ;;  %v2281_v39 = vld [vmem:[%s4096_s6 + $0x258] sm:$0xff] }
 0x11c   : > { %1076 = vmatpush1.msra.mxu0 %v1053_v58  ;;  %v1538_v58 = vld [vmem:[%s4098_s8 + $0xc0] sm:$0xff] }
 0x11d   : > { %1077 = vmatprep.subr.mxu0 %v1052_v40  ;;  %823 = vmatmul.mubr.f32.gmra.mxu0 %v2805_v4  ;;  %v1045_v4 = vld [vmem:[%s4096_s6 + $0x60] sm:$0xff]  ;;  %v2280_v40 = vld [vmem:[%s4096_s6 + $0x250] sm:$0xff] }
 0x11e   : > { %1078 = vmatpush1.msra.mxu0 %v1051_v41  ;;  %1129 = vmatprep.mubr.f32.mxu0 %v2521_v23  ;;  %v1537_v41 = vld [vmem:[%s4098_s8 + $0xb8] sm:$0xff] }
 0x11f   : > { %1079 = vmatprep.subr.mxu0 %v1050_v42  ;;  %v2279_v42 = vld [vmem:[%s4096_s6 + $0x248] sm:$0xff] }
 0x120   : > { %1080 = vmatpush1.msra.mxu0 %v1049_v63  ;;  %v1536_v63 = vld [vmem:[%s4098_s8 + $0xb0] sm:$0xff] }
 0x121   : > { %1081 = vmatprep.subr.mxu0 %v1048_v43  ;;  %v2278_v43 = vld [vmem:[%s4096_s6 + $0x240] sm:$0xff] }
 0x122   : > { %1082 = vmatpush1.msra.mxu0 %v1047_v44  ;;  %v1535_v44 = vld [vmem:[%s4098_s8 + $0xa8] sm:$0xff] }
 0x123   : > { %1083 = vmatprep.subr.mxu0 %v1046_v45  ;;  %v2277_v45 = vld [vmem:[%s4096_s6 + $0x238] sm:$0xff] }
 0x124   : > { %1084 = vmatpush1.msra.mxu0 %v1045_v4  ;;  %v1534_v4 = vld [vmem:[%s4098_s8 + $0xa0] sm:$0xff] }
 0x125   : > { %1085 = vmatprep.subr.mxu0 %v1044_v46  ;;  %v2276_v46 = vld [vmem:[%s4096_s6 + $0x230] sm:$0xff] }
 0x126   : > { %1086 = vmatpush1.msra.mxu0 %v1043_v47  ;;  %v1533_v47 = vld [vmem:[%s4098_s8 + $0x98] sm:$0xff] }
 0x127   : > { %1087 = vmatprep.subr.mxu0 %v1042_v48  ;;  %v2275_v48 = vld [vmem:[%s4096_s6 + $0x228] sm:$0xff] }
 0x128   : > { %1088 = vmatpush1.msra.mxu0 %v1041_v49  ;;  %v1532_v49 = vld [vmem:[%s4098_s8 + $0x90] sm:$0xff] }
 0x129   : > { %1089 = vmatprep.subr.mxu0 %v1040_v50  ;;  %v2274_v50 = vld [vmem:[%s4096_s6 + $0x220] sm:$0xff] }
 0x12a   : > { %1090 = vmatpush1.msra.mxu0 %v1039_v51  ;;  %v1531_v51 = vld [vmem:[%s4098_s8 + $0x88] sm:$0xff] }
 0x12b   : > { %1091 = vmatprep.subr.mxu0 %v1038_v52  ;;  %v2273_v52 = vld [vmem:[%s4096_s6 + $0x218] sm:$0xff] }
 0x12c   : > { %1092 = vmatpush1.msra.mxu0 %v1037_v54  ;;  %v2272_v54 = vld [vmem:[%s4096_s6 + $0x210] sm:$0xff] }
 0x12d   : > { %1093 = vmatprep.subr.mxu0 %v1036_v55  ;;  %v2271_v55 = vld [vmem:[%s4096_s6 + $0x208] sm:$0xff] }
 0x12e   : > { %1094 = vmatpush1.msra.mxu0 %v1035_v57  ;;  %v2333_v57 = vld [vmem:[%s4098_s8 + $0x2f8] sm:$0xff] }
 0x12f   : > { %1095 = vmatprep.subr.mxu0 %v1034_v60  ;;  %v2331_v60 = vld [vmem:[%s4098_s8 + $0x2e8] sm:$0xff] }
 0x130   : > { %1096 = vmatpush1.msra.mxu0 %v1033_v62  ;;  %v2329_v62 = vld [vmem:[%s4098_s8 + $0x2d8] sm:$0xff] }
 0x131   : > { %1309 = vmatprep.subr.mxu0 %v2301_v2  ;;  %v2326_v2 = vld [vmem:[%s4098_s8 + $0x2c0] sm:$0xff] }
 0x1b1   : > { %v2500_v5 = vpop.f32.mrf.mxu0 }
 0x1b2   : > { %v3212_v16 = vadd.f32 %v2500_v5, %v2169_v6  ;;  %v2324_v5 = vld [vmem:[%s4098_s8 + $0x2b0] sm:$0xff] }
 0x1b3   : > { %v563_v7 = vpop.f32.mrf.mxu0 }
 0x1b4   : > { %v3192_v8 = vadd.f32 %v2169_v6, %v563_v7  ;;  %v2322_v7 = vld [vmem:[%s4098_s8 + $0x2a0] sm:$0xff] }
 0x1b5   : > { %v2503_v11 = vpop.f32.mrf.mxu0 }
 0x1b6   : > { %1130 = vmatmul.mubr.f32.vlgmr.msra.gmra.mxu0 %v3192_v8  ;;  %1252 = vmatmul.mubr.f32.vlgmr.msra.gmra.mxu1 %v3192_v8  ;;  %v3239_v25 = vadd.f32 %v2503_v11, %v2169_v6  ;;  %v1529_v11 = vld [vmem:[%s4098_s8 + $0x78] sm:$0xff] }
 0x1b7   : > { %1310 = vmatpush1.msra.mxu0 %v2300_v9  ;;  %1135 = vmatprep.mubr.f32.mxu0 %v2521_v23  ;;  %v573_v15 = vpop.f32.mrf.mxu0  ;;  %v2320_v9 = vld [vmem:[%s4098_s8 + $0x290] sm:$0xff] }
 0x1b8   : > { %1311 = vmatprep.subr.mxu0 %v2299_v10  ;;  %1257 = vmatprep.mubr.f32.mxu1 %v2521_v23  ;;  %v3222_v19 = vadd.f32 %v2169_v6, %v573_v15  ;;  %v2323_v6 = vld [vmem:[%s4098_s8 + $0x2a8] sm:$0xff]  ;;  %v1530_v10 = vld [vmem:[%s4098_s8 + $0x80] sm:$0xff] }
 0x1b9   : > { %1312 = vmatpush1.msra.mxu0 %v2298_v12  ;;  %1579 = vmatpush1.msra.mxu1 %v1544_v13  ;;  %v2318_v12 = vld [vmem:[%s4098_s8 + $0x280] sm:$0xff]  ;;  %v1528_v13 = vld [vmem:[%s4098_s8 + $0x70] sm:$0xff]  ;;  %v1527_v15 = vld [vmem:[%s4098_s8 + $0x68] sm:$0xff] }
 0x1ba   : > { %1313 = vmatprep.subr.mxu0 %v2297_v14  ;;  %1136 = vmatmul.mubr.f32.gmra.mxu0 %v3212_v16  ;;  %v2317_v14 = vld [vmem:[%s4098_s8 + $0x278] sm:$0xff] }
 0x1bb   : > { %1258 = vmatmul.mubr.f32.gmra.mxu1 %v3212_v16  ;;  %1314 = vmatpush1.msra.mxu0 %v2296_v17  ;;  %v1526_v17 = vld [vmem:[%s4098_s8 + $0x60] sm:$0xff] }
 0x1bc   : > { %1315 = vmatprep.subr.mxu0 %v2295_v18  ;;  %1141 = vmatprep.mubr.f32.mxu0 %v2521_v23  ;;  %v2315_v18 = vld [vmem:[%s4098_s8 + $0x268] sm:$0xff] }
 0x1bd   : > { %1316 = vmatpush1.msra.mxu0 %v2294_v20  ;;  %1263 = vmatprep.mubr.f32.mxu1 %v2521_v23  ;;  %v2314_v20 = vld [vmem:[%s4098_s8 + $0x260] sm:$0xff] }
 0x1be   : > { %1317 = vmatprep.subr.mxu0 %v2293_v21  ;;  %1142 = vmatmul.mubr.f32.gmra.mxu0 %v3222_v19  ;;  %v1524_v21 = vld [vmem:[%s4098_s8 + $0x50] sm:$0xff] }
 0x1bf   : > { %1318 = vmatpush1.msra.mxu0 %v2292_v22  ;;  %1264 = vmatmul.mubr.f32.gmra.mxu1 %v3222_v19  ;;  %v2313_v22 = vld [vmem:[%s4098_s8 + $0x258] sm:$0xff] }
 0x1c0   : > { %1319 = vmatprep.subr.mxu0 %v2291_v24  ;;  %1147 = vmatprep.mubr.f32.mxu0 %v2521_v23  ;;  %v1523_v24 = vld [vmem:[%s4098_s8 + $0x48] sm:$0xff] }
 0x1c1   : > { %1320 = vmatpush1.msra.mxu0 %v2290_v26  ;;  %1269 = vmatprep.mubr.f32.mxu1 %v2521_v23  ;;  %v1522_v26 = vld [vmem:[%s4098_s8 + $0x40] sm:$0xff] }
 0x1c2   : > { %1321 = vmatprep.subr.mxu0 %v2289_v27  ;;  %1148 = vmatmul.mubr.f32.gmra.mxu0 %v3239_v25  ;;  %v2311_v27 = vld [vmem:[%s4098_s8 + $0x248] sm:$0xff] }
 0x1c3   : > { %1322 = vmatpush1.msra.mxu0 %v2288_v28  ;;  %1270 = vmatmul.mubr.f32.gmra.mxu1 %v3239_v25  ;;  %v1521_v28 = vld [vmem:[%s4098_s8 + $0x38] sm:$0xff] }
 0x1c4   : > { %1323 = vmatprep.subr.mxu0 %v2287_v29  ;;  %1373 = vmatprep.mubr.f32.mxu0 %v2521_v23  ;;  %v2310_v29 = vld [vmem:[%s4098_s8 + $0x240] sm:$0xff] }
 0x1c5   : > { %1324 = vmatpush1.msra.mxu0 %v2286_v30  ;;  %1580 = vmatprep.subr.mxu1 %v1543_v31  ;;  %v1520_v30 = vld [vmem:[%s4098_s8 + $0x30] sm:$0xff]  ;;  %v2309_v31 = vld [vmem:[%s4098_s8 + $0x238] sm:$0xff] }
 0x1c6   : > { %1325 = vmatprep.subr.mxu0 %v2285_v32  ;;  %1581 = vmatpush1.msra.mxu1 %v1542_v33  ;;  %v1519_v32 = vld [vmem:[%s4098_s8 + $0x28] sm:$0xff]  ;;  %v2308_v33 = vld [vmem:[%s4098_s8 + $0x230] sm:$0xff] }
 0x1c7   : > { %1326 = vmatpush1.msra.mxu0 %v2284_v34  ;;  %1582 = vmatprep.subr.mxu1 %v1541_v35  ;;  %v1518_v34 = vld [vmem:[%s4098_s8 + $0x20] sm:$0xff]  ;;  %v2307_v35 = vld [vmem:[%s4098_s8 + $0x228] sm:$0xff] }
 0x1c8   : > { %1327 = vmatprep.subr.mxu0 %v2283_v53  ;;  %1583 = vmatpush1.msra.mxu1 %v1540_v36  ;;  %v1517_v53 = vld [vmem:[%s4098_s8 + $0x18] sm:$0xff]  ;;  %v2306_v36 = vld [vmem:[%s4098_s8 + $0x220] sm:$0xff] }
 0x1c9   : > { %1328 = vmatpush1.msra.mxu0 %v2282_v37  ;;  %1584 = vmatprep.subr.mxu1 %v1539_v38  ;;  %v1516_v37 = vld [vmem:[%s4098_s8 + $0x10] sm:$0xff]  ;;  %v2305_v38 = vld [vmem:[%s4098_s8 + $0x218] sm:$0xff] }
 0x1ca   : > { %1329 = vmatprep.subr.mxu0 %v2281_v39  ;;  %1585 = vmatpush1.msra.mxu1 %v1538_v58  ;;  %v1515_v39 = vld [vmem:[%s4098_s8 + $0x8] sm:$0xff]  ;;  %v2304_v58 = vld [vmem:[%s4098_s8 + $0x210] sm:$0xff] }
 0x1cb   : > { %1330 = vmatpush1.msra.mxu0 %v2280_v40  ;;  %1586 = vmatprep.subr.mxu1 %v1537_v41  ;;  %v1514_v40 = vld [vmem:[%s4098_s8] sm:$0xff]  ;;  %v2303_v41 = vld [vmem:[%s4098_s8 + $0x208] sm:$0xff] }
 0x1cc   : > { %1331 = vmatprep.subr.mxu0 %v2279_v42  ;;  %1587 = vmatpush1.msra.mxu1 %v1536_v63  ;;  %v1577_v42 = vld [vmem:[%s4098_s8 + $0x1f8] sm:$0xff]  ;;  %v2302_v63 = vld [vmem:[%s4098_s8 + $0x200] sm:$0xff] }
 0x1cd   : > { %1332 = vmatpush1.msra.mxu0 %v2278_v43  ;;  %1588 = vmatprep.subr.mxu1 %v1535_v44  ;;  %v1576_v43 = vld [vmem:[%s4098_s8 + $0x1f0] sm:$0xff]  ;;  %v2365_v44 = vld [vmem:[%s4098_s8 + $0x3f8] sm:$0xff] }
 0x1ce   : > { %1333 = vmatprep.subr.mxu0 %v2277_v45  ;;  %1589 = vmatpush1.msra.mxu1 %v1534_v4  ;;  %v1575_v45 = vld [vmem:[%s4098_s8 + $0x1e8] sm:$0xff]  ;;  %v2364_v4 = vld [vmem:[%s4098_s8 + $0x3f0] sm:$0xff] }
 0x1cf   : > { %1334 = vmatpush1.msra.mxu0 %v2276_v46  ;;  %1590 = vmatprep.subr.mxu1 %v1533_v47  ;;  %v1574_v46 = vld [vmem:[%s4098_s8 + $0x1e0] sm:$0xff]  ;;  %v2363_v47 = vld [vmem:[%s4098_s8 + $0x3e8] sm:$0xff] }
 0x1d0   : > { %1335 = vmatprep.subr.mxu0 %v2275_v48  ;;  %1591 = vmatpush1.msra.mxu1 %v1532_v49  ;;  %v1573_v48 = vld [vmem:[%s4098_s8 + $0x1d8] sm:$0xff]  ;;  %v2362_v49 = vld [vmem:[%s4098_s8 + $0x3e0] sm:$0xff] }
 0x1d1   : > { %1336 = vmatpush1.msra.mxu0 %v2274_v50  ;;  %1592 = vmatprep.subr.mxu1 %v1531_v51  ;;  %v1572_v50 = vld [vmem:[%s4098_s8 + $0x1d0] sm:$0xff]  ;;  %v2361_v51 = vld [vmem:[%s4098_s8 + $0x3d8] sm:$0xff] }
 0x1d2   : > { %1337 = vmatprep.subr.mxu0 %v2273_v52  ;;  %1593 = vmatpush1.msra.mxu1 %v1530_v10  ;;  %v1571_v52 = vld [vmem:[%s4098_s8 + $0x1c8] sm:$0xff]  ;;  %v1562_v10 = vld [vmem:[%s4098_s8 + $0x180] sm:$0xff] }
 0x1d3   : > { %1338 = vmatpush1.msra.mxu0 %v2272_v54  ;;  %1594 = vmatprep.subr.mxu1 %v1529_v11  ;;  %v2360_v54 = vld [vmem:[%s4098_s8 + $0x3d0] sm:$0xff]  ;;  %v1561_v11 = vld [vmem:[%s4098_s8 + $0x178] sm:$0xff] }
 0x1d4   : > { %1339 = vmatprep.subr.mxu0 %v2271_v55  ;;  %1595 = vmatpush1.msra.mxu1 %v1528_v13  ;;  %v1570_v55 = vld [vmem:[%s4098_s8 + $0x1c0] sm:$0xff]  ;;  %v1560_v13 = vld [vmem:[%s4098_s8 + $0x170] sm:$0xff] }
 0x1d5   : > { %1340 = vmatpush1.msra.mxu0 %v2270_v56  ;;  %1596 = vmatprep.subr.mxu1 %v1527_v15  ;;  %v2359_v56 = vld [vmem:[%s4098_s8 + $0x3c8] sm:$0xff] }
 0x1d6   : > { %1374 = vmatmul.mubr.f32.vlgmr.msra.gmra.mxu0 %v3192_v8  ;;  %1732 = vmatprep.subr.mxu0 %v2333_v57  ;;  %v2321_v8 = vld [vmem:[%s4098_s8 + $0x298] sm:$0xff]  ;;  %v1559_v15 = vld [vmem:[%s4098_s8 + $0x168] sm:$0xff] }
 0x1d7   : > { %1379 = vmatprep.mubr.f32.mxu0 %v2521_v23  ;;  %1733 = vmatpush1.msra.mxu0 %v2332_v59  ;;  %v1569_v57 = vld [vmem:[%s4098_s8 + $0x1b8] sm:$0xff]  ;;  %v2358_v59 = vld [vmem:[%s4098_s8 + $0x3c0] sm:$0xff] }
 0x1d8   : > { %1734 = vmatprep.subr.mxu0 %v2331_v60  ;;  %1597 = vmatpush1.msra.mxu1 %v1526_v17  ;;  %v1568_v60 = vld [vmem:[%s4098_s8 + $0x1b0] sm:$0xff]  ;;  %v1558_v17 = vld [vmem:[%s4098_s8 + $0x160] sm:$0xff] }
 0x1d9   : > { %1735 = vmatpush1.msra.mxu0 %v2330_v61  ;;  %v2357_v61 = vld [vmem:[%s4098_s8 + $0x3b8] sm:$0xff] }
 0x1da   : > { %1380 = vmatmul.mubr.f32.gmra.mxu0 %v3212_v16  ;;  %1736 = vmatprep.subr.mxu0 %v2329_v62  ;;  %v2316_v16 = vld [vmem:[%s4098_s8 + $0x270] sm:$0xff]  ;;  %v1567_v62 = vld [vmem:[%s4098_s8 + $0x1a8] sm:$0xff] }
 0x1db   : > { %1385 = vmatprep.mubr.f32.mxu0 %v2521_v23  ;;  %1737 = vmatpush1.msra.mxu0 %v2328_v0  ;;  %v2356_v0 = vld [vmem:[%s4098_s8 + $0x3b0] sm:$0xff] }
 0x1dc   : > { %1738 = vmatprep.subr.mxu0 %v2327_v1  ;;  %v1566_v1 = vld [vmem:[%s4098_s8 + $0x1a0] sm:$0xff] }
 0x1dd   : > { %1739 = vmatpush1.msra.mxu0 %v2326_v2  ;;  %v2355_v2 = vld [vmem:[%s4098_s8 + $0x3a8] sm:$0xff] }
 0x1de   : > { %1386 = vmatmul.mubr.f32.gmra.mxu0 %v3222_v19  ;;  %1740 = vmatprep.subr.mxu0 %v2325_v3  ;;  %v1525_v19 = vld [vmem:[%s4098_s8 + $0x58] sm:$0xff] }
 0x1df   : > { %1391 = vmatprep.mubr.f32.mxu0 %v2521_v23  ;;  %1741 = vmatpush1.msra.mxu0 %v2324_v5  ;;  %v2319_v23 = vld [vmem:[%s4098_s8 + $0x288] sm:$0xff]  ;;  %v1565_v3 = vld [vmem:[%s4098_s8 + $0x198] sm:$0xff]  ;;  %v2354_v5 = vld [vmem:[%s4098_s8 + $0x3a0] sm:$0xff] }
 0x1e0   : > { %1742 = vmatprep.subr.mxu0 %v2323_v6  ;;  %1598 = vmatprep.subr.mxu1 %v1525_v19  ;;  %v1564_v6 = vld [vmem:[%s4098_s8 + $0x190] sm:$0xff]  ;;  %v1557_v19 = vld [vmem:[%s4098_s8 + $0x158] sm:$0xff] }
 0x1e1   : > { %1743 = vmatpush1.msra.mxu0 %v2322_v7  ;;  %1599 = vmatpush1.msra.mxu1 %v1524_v21  ;;  %v2353_v7 = vld [vmem:[%s4098_s8 + $0x398] sm:$0xff]  ;;  %v1556_v21 = vld [vmem:[%s4098_s8 + $0x150] sm:$0xff] }
 0x1e2   : > { %1392 = vmatmul.mubr.f32.gmra.mxu0 %v3239_v25  ;;  %1744 = vmatprep.subr.mxu0 %v2321_v8  ;;  %v2312_v25 = vld [vmem:[%s4098_s8 + $0x250] sm:$0xff]  ;;  %v1563_v8 = vld [vmem:[%s4098_s8 + $0x188] sm:$0xff] }
 0x1e3   : > { %1745 = vmatpush1.msra.mxu0 %v2320_v9  ;;  %1600 = vmatprep.subr.mxu1 %v1523_v24  ;;  %v2352_v9 = vld [vmem:[%s4098_s8 + $0x390] sm:$0xff]  ;;  %v1555_v24 = vld [vmem:[%s4098_s8 + $0x148] sm:$0xff] }
 0x1e4   : > { %1746 = vmatprep.subr.mxu0 %v2319_v23  ;;  %1601 = vmatpush1.msra.mxu1 %v1522_v26  ;;  %v2351_v23 = vld [vmem:[%s4098_s8 + $0x388] sm:$0xff]  ;;  %v1554_v26 = vld [vmem:[%s4098_s8 + $0x140] sm:$0xff] }
 0x1e5   : > { %1747 = vmatpush1.msra.mxu0 %v2318_v12  ;;  %1602 = vmatprep.subr.mxu1 %v1521_v28  ;;  %v2350_v12 = vld [vmem:[%s4098_s8 + $0x380] sm:$0xff]  ;;  %v1553_v28 = vld [vmem:[%s4098_s8 + $0x138] sm:$0xff] }
 0x1e6   : > { %1748 = vmatprep.subr.mxu0 %v2317_v14  ;;  %1603 = vmatpush1.msra.mxu1 %v1520_v30  ;;  %v2349_v14 = vld [vmem:[%s4098_s8 + $0x378] sm:$0xff]  ;;  %v1552_v30 = vld [vmem:[%s4098_s8 + $0x130] sm:$0xff] }
 0x1e7   : > { %1749 = vmatpush1.msra.mxu0 %v2316_v16  ;;  %1604 = vmatprep.subr.mxu1 %v1519_v32  ;;  %v2348_v16 = vld [vmem:[%s4098_s8 + $0x370] sm:$0xff]  ;;  %v1551_v32 = vld [vmem:[%s4098_s8 + $0x128] sm:$0xff] }
 0x1e8   : > { %1750 = vmatprep.subr.mxu0 %v2315_v18  ;;  %1605 = vmatpush1.msra.mxu1 %v1518_v34  ;;  %v2347_v18 = vld [vmem:[%s4098_s8 + $0x368] sm:$0xff]  ;;  %v1550_v34 = vld [vmem:[%s4098_s8 + $0x120] sm:$0xff] }
 0x1e9   : > { %1751 = vmatpush1.msra.mxu0 %v2314_v20  ;;  %1606 = vmatprep.subr.mxu1 %v1517_v53  ;;  %v2346_v20 = vld [vmem:[%s4098_s8 + $0x360] sm:$0xff]  ;;  %v1549_v53 = vld [vmem:[%s4098_s8 + $0x118] sm:$0xff] }
 0x1ea   : > { %1752 = vmatprep.subr.mxu0 %v2313_v22  ;;  %1607 = vmatpush1.msra.mxu1 %v1516_v37  ;;  %v2345_v22 = vld [vmem:[%s4098_s8 + $0x358] sm:$0xff]  ;;  %v1548_v37 = vld [vmem:[%s4098_s8 + $0x110] sm:$0xff] }
 0x1eb   : > { %1753 = vmatpush1.msra.mxu0 %v2312_v25  ;;  %1608 = vmatprep.subr.mxu1 %v1515_v39  ;;  %v2344_v25 = vld [vmem:[%s4098_s8 + $0x350] sm:$0xff]  ;;  %v1547_v39 = vld [vmem:[%s4098_s8 + $0x108] sm:$0xff] }
 0x1ec   : > { %1754 = vmatprep.subr.mxu0 %v2311_v27  ;;  %1609 = vmatpush1.msra.mxu1 %v1514_v40  ;;  %v2343_v27 = vld [vmem:[%s4098_s8 + $0x348] sm:$0xff]  ;;  %v1546_v40 = vld [vmem:[%s4098_s8 + $0x100] sm:$0xff] }
 0x1ed   : > { %1755 = vmatpush1.msra.mxu0 %v2310_v29  ;;  %1610 = vmatprep.subr.mxu1 %v1577_v42  ;;  %v2342_v29 = vld [vmem:[%s4098_s8 + $0x340] sm:$0xff] }
 0x1ee   : > { %1756 = vmatprep.subr.mxu0 %v2309_v31  ;;  %1611 = vmatpush2.msra.mxu1 %v1576_v43  ;;  %v2341_v31 = vld [vmem:[%s4098_s8 + $0x338] sm:$0xff]  ;;  %v2334_v42 = vld [vmem:[%s4098_s8 + $0x300] sm:$0xff]  ;;  %v684_v43 = vpop.f32.mrf.mxu1 }
 0x1ef   : > { %1757 = vmatpush1.msra.mxu0 %v2308_v33  ;;  %1612 = vmatprep.subr.mxu1 %v1575_v45  ;;  %v2340_v33 = vld [vmem:[%s4098_s8 + $0x330] sm:$0xff] }
 0x1f0   : > { %1758 = vmatprep.subr.mxu0 %v2307_v35  ;;  %1613 = vmatpush2.msra.mxu1 %v1574_v46  ;;  %v2339_v35 = vld [vmem:[%s4098_s8 + $0x328] sm:$0xff] }
 0x1f1   : > { %1759 = vmatpush1.msra.mxu0 %v2306_v36  ;;  %1614 = vmatprep.subr.mxu1 %v1573_v48  ;;  %v2338_v36 = vld [vmem:[%s4098_s8 + $0x320] sm:$0xff] }
 0x1f2   : > { %1760 = vmatprep.subr.mxu0 %v2305_v38  ;;  %1615 = vmatpush2.msra.mxu1 %v1572_v50  ;;  %v2337_v38 = vld [vmem:[%s4098_s8 + $0x318] sm:$0xff] }
 0x1f3   : > { %1761 = vmatpush1.msra.mxu0 %v2304_v58  ;;  %1616 = vmatprep.subr.mxu1 %v1571_v52  ;;  %v2336_v58 = vld [vmem:[%s4098_s8 + $0x310] sm:$0xff] }
 0x1f4   : > { %1762 = vmatprep.subr.mxu0 %v2303_v41  ;;  %1617 = vmatpush2.msra.mxu1 %v1570_v55  ;;  %v2335_v41 = vld [vmem:[%s4098_s8 + $0x308] sm:$0xff] }
 0x1f5   : > { %1763 = vmatpush1.msra.mxu0 %v2302_v63  ;;  %1618 = vmatprep.subr.mxu1 %v1569_v57  ;;  %v2397_v63 = vld [vmem:[%s4098_s8 + $0x4f8] sm:$0xff] }
 0x1f6   : > { %1764 = vmatprep.subr.mxu0 %v2365_v44  ;;  %1619 = vmatpush2.msra.mxu1 %v1568_v60  ;;  %v686_v44 = vpop.f32.mrf.mxu1 }
 0x1f7   : > { %1765 = vmatpush2.msra.mxu0 %v2364_v4  ;;  %1620 = vmatprep.subr.mxu1 %v1567_v62 }
 0x1f8   : > { %1766 = vmatprep.subr.mxu0 %v2363_v47  ;;  %1621 = vmatpush2.msra.mxu1 %v1566_v1  ;;  %v690_v45 = vpop.f32.mrf.mxu1  ;;  %v806_v47 = vpop.f32.mrf.mxu0 }
 0x1f9   : > { %1767 = vmatpush2.msra.mxu0 %v2362_v49  ;;  %1622 = vmatprep.subr.mxu1 %v1565_v3 }
 0x1fa   : > { %1768 = vmatprep.subr.mxu0 %v2361_v51  ;;  %1623 = vmatpush2.msra.mxu1 %v1564_v6  ;;  %v692_v4 = vpop.f32.mrf.mxu1  ;;  %v808_v49 = vpop.f32.mrf.mxu0 }
 0x1fb   : > { %1769 = vmatpush2.msra.mxu0 %v2360_v54  ;;  %1624 = vmatprep.subr.mxu1 %v1563_v8 }
 0x1fc   : > { %1770 = vmatprep.subr.mxu0 %v2359_v56  ;;  %1625 = vmatpush2.msra.mxu1 %v1562_v10  ;;  %v3699_v46 = vpop.f32.mrf.mxu1  ;;  %v812_v50 = vpop.f32.mrf.mxu0 }
 0x1fd   : > { %1771 = vmatpush2.msra.mxu0 %v2358_v59  ;;  %1626 = vmatprep.subr.mxu1 %v1561_v11  ;;  %v960_v11 = vrot.slane %v684_v43, 7 }
 0x1fe   : > { %1772 = vmatprep.subr.mxu0 %v2357_v61  ;;  %1627 = vmatpush2.msra.mxu1 %v1560_v13  ;;  %v3701_v48 = vpop.f32.mrf.mxu1  ;;  %v814_v52 = vpop.f32.mrf.mxu0  ;;  %v962_v13 = vrot.slane %v690_v45, 7 }
 0x1ff   : > { %1773 = vmatpush2.msra.mxu0 %v2356_v0  ;;  %1628 = vmatprep.subr.mxu1 %v1559_v15  ;;  %v966_v15 = vrot.slane %v3699_v46, 7 }
 0x200   : > { %1774 = vmatprep.subr.mxu0 %v2355_v2  ;;  %1629 = vmatpush2.msra.mxu1 %v1558_v17  ;;  %v3703_v51 = vpop.f32.mrf.mxu1  ;;  %v818_v55 = vpop.f32.mrf.mxu0 }
 0x201   : > { %1775 = vmatpush2.msra.mxu0 %v2354_v5  ;;  %1630 = vmatprep.subr.mxu1 %v1557_v19 }
 0x202   : > { %1776 = vmatprep.subr.mxu0 %v2353_v7  ;;  %1631 = vmatpush2.msra.mxu1 %v1556_v21  ;;  %v3705_v54 = vpop.f32.mrf.mxu1  ;;  %v820_v57 = vpop.f32.mrf.mxu0 }
 0x203   : > { %1777 = vmatpush2.msra.mxu0 %v2352_v9  ;;  %1632 = vmatprep.subr.mxu1 %v1555_v24  ;;  %v982_v24 = vsel %vm959_vm1, 0.0, %v960_v11 }
 0x204   : > { %1778 = vmatprep.subr.mxu0 %v2351_v23  ;;  %1633 = vmatpush2.msra.mxu1 %v1554_v26  ;;  %v928_v56 = vpop.f32.mrf.mxu1  ;;  %v3707_v60 = vpop.f32.mrf.mxu0 }
 0x205   : > { %1779 = vmatpush2.msra.mxu0 %v2350_v12  ;;  %1634 = vmatprep.subr.mxu1 %v1553_v28  ;;  %v961_v12 = vrot.slane %v686_v44, 7  ;;  %v1001_v19 = vrot.slane %v928_v56, 1 }
 0x206   : > { %1780 = vmatprep.subr.mxu0 %v2349_v14  ;;  %1635 = vmatpush2.msra.mxu1 %v1552_v30  ;;  %v930_v59 = vpop.f32.mrf.mxu1  ;;  %v3709_v62 = vpop.f32.mrf.mxu0  ;;  %v964_v14 = vrot.slane %v692_v4, 7 }
 0x207   : > { %1781 = vmatpush2.msra.mxu0 %v2348_v16  ;;  %1636 = vmatprep.subr.mxu1 %v1551_v32  ;;  %v968_v16 = vrot.slane %v3701_v48, 7  ;;  %v983_v28 = vsel %vm959_vm1, 0.0, %v961_v12  ;;  %v970_v32 = vrot.slane %v3703_v51, 7 }
 0x208   : > { %1782 = vmatprep.subr.mxu0 %v2347_v18  ;;  %1637 = vmatpush2.msra.mxu1 %v1550_v34  ;;  %v934_v61 = vpop.f32.mrf.mxu1  ;;  %v965_v30 = vsel %vm959_vm1, %v961_v12, %v964_v14  ;;  %v1486_v12 = vld [vmem:[%s4097_s7] sm:$0x3] }
 0x209   : > { %1783 = vmatpush2.msra.mxu0 %v2346_v20  ;;  %1638 = vmatprep.subr.mxu1 %v1549_v53  ;;  %v1004_v20 = vrot.slane %v930_v59, 1  ;;  %v1002_v21 = vrot.slane %v934_v61, 1  ;;  %v987_v44 = vadd.f32 %v965_v30, %v814_v52 }
 0x20a   : > { %1784 = vmatprep.subr.mxu0 %v2345_v22  ;;  %1639 = vmatpush2.msra.mxu1 %v1548_v37  ;;  %v936_v1 = vpop.f32.mrf.mxu1 }
 0x20b   : > { %1785 = vmatpush2.msra.mxu0 %v2344_v25  ;;  %1640 = vmatprep.subr.mxu1 %v1547_v39  ;;  %v1005_v22 = vrot.slane %v936_v1, 1  ;;  %v1003_v37 = vsel %vm1000_vm2, %v1001_v19, %v1002_v21 }
 0x20c   : > { %1786 = vmatprep.subr.mxu0 %v2343_v27  ;;  %1641 = vmatpush2.msra.mxu1 %v1546_v40  ;;  %v940_v2 = vpop.f32.mrf.mxu1  ;;  %v1488_v27 = vlaneseq  ;;  %v985_v40 = vadd.f32 %v983_v28, %v808_v49 }
 0x20d   : > { %1787 = vmatpush2.msra.mxu0 %v2342_v29  ;;  %1886 = vmatprep.subr.mxu1 %v2397_v63  ;;  %v1007_v25 = vrot.slane %v940_v2, 1  ;;  %v963_v29 = vsel %vm959_vm1, %v960_v11, %v962_v13 }
 0x20e   : > { %1788 = vmatprep.subr.mxu0 %v2341_v31  ;;  %v942_v5 = vpop.f32.mrf.mxu1  ;;  %v967_v31 = vsel %vm959_vm1, %v962_v13, %v966_v15  ;;  %v3747_v63 = vshrl.u32 %v1488_v27, 7  ;;  %v986_v43 = vadd.f32 %v963_v29, %v812_v50  ;;  %v971_v50 = vsel %vm959_vm1, %v966_v15, %v970_v32 }
 0x20f   : > { %1789 = vmatpush2.msra.mxu0 %v2340_v33  ;;  %v1009_v33 = vrot.slane %v942_v5, 1  ;;  %v988_v45 = vadd.f32 %v967_v31, %v818_v55 }
 0x210   : > { %1790 = vmatprep.subr.mxu0 %v2339_v35  ;;  %v3717_v7 = vpop.f32.mrf.mxu1  ;;  %v969_v35 = vsel %vm959_vm1, %v964_v14, %v968_v16  ;;  %v3772_v14 = vadd.f32 %v971_v50, %v3707_v60 }
 0x211   : > { %1791 = vmatpush2.msra.mxu0 %v2338_v36  ;;  %v1011_v34 = vrot.slane %v3717_v7, 1  ;;  %v972_v36 = vrot.slane %v3705_v54, 7  ;;  %v1010_v46 = vsel %vm1000_vm2, %v1005_v22, %v1009_v33  ;;  %v989_v51 = vadd.f32 %v969_v35, %v820_v57  ;;  %v2394_v7 = vld [vmem:[%s4098_s8 + $0x4e0] sm:$0xff] }
 0x212   : > { %1792 = vmatprep.subr.mxu0 %v2337_v38  ;;  %v948_v9 = vpop.f32.mrf.mxu1  ;;  %v1006_v38 = vsel %vm1000_vm2, %v1004_v20, %v1005_v22  ;;  %v1490_v57 = vsub.s32 0, %v3747_v63  ;;  %v1494_v22 = vsub.s32 1, %v3747_v63 }
 0x213   : > { %1793 = vmatpush2.msra.mxu0 %v2336_v58  ;;  %v1013_v39 = vrot.slane %v948_v9, 1  ;;  %v984_v58 = vadd.f32 %v982_v24, %v806_v47  ;;  %v1012_v48 = vsel %vm1000_vm2, %v1007_v25, %v1011_v34  ;;  %v973_v52 = vsel %vm959_vm1, %v968_v16, %v972_v36 }
 0x214   : > { %1794 = vmatprep.subr.mxu0 %v2335_v41  ;;  %v1008_v41 = vsel %vm1000_vm2, %v1002_v21, %v1007_v25  ;;  %v1026_v61 = vadd.f32 %v1006_v38, %v985_v40  ;;  %v3763_v9 = vadd.f32 %v1012_v48, %v988_v45  ;;  %v991_v19 = vadd.f32 %v973_v52, %v3709_v62 }
 0x215   : > { %1795 = vmatpush2.msra.mxu0 %v2334_v42  ;;  %v1024_v56 = vsel %vm1000_vm2, %v1013_v39, 0.0  ;;  %v1014_v59 = vsel %vm1000_vm2, %v1009_v33, %v1013_v39  ;;  %v1025_v55 = vadd.f32 %v1003_v37, %v984_v58  ;;  %v1027_v5 = vadd.f32 %v1008_v41, %v986_v43 }
 0x216   : > { %v3769_v13 = vadd.f32 %v1014_v59, %v989_v51  ;;  %v3783_v60 = vrot.slane %v1486_v12, %v1490_v57 }
 0x276   : > { %v3711_v0 = vpop.f32.mrf.mxu0  ;;  %v3721_v10 = vpop.f32.mrf.mxu1 }
 0x277   : > { %v1406_v4 = vrot.slane %v3711_v0, 7 }
 0x278   : > { %v3713_v3 = vpop.f32.mrf.mxu0  ;;  %v3727_v17 = vpop.f32.mrf.mxu1 }
 0x279   : > { %v1407_v47 = vrot.slane %v3713_v3, 7  ;;  %v3761_v3 = vadd.f32 %v1010_v46, %v987_v44  ;;  %v1428_v11 = vsel %vm959_vm1, 0.0, %v1406_v4  ;;  %v1032_v44 = vadd.f32 %v1024_v56, %v991_v19 }
 0x27a   : > { %v3715_v6 = vpop.f32.mrf.mxu0  ;;  %v1430_v24 = vadd.f32 %v1428_v11, %v3721_v10 }
 0x27b   : > { %v1259_v53 = vpop.f32.mrf.mxu1  ;;  %v1408_v0 = vrot.slane %v3715_v6, 7  ;;  %v1429_v6 = vsel %vm959_vm1, 0.0, %v1407_v47 }
 0x27c   : > { %v3719_v8 = vpop.f32.mrf.mxu0 }
 0x27d   : > { %v1261_v49 = vpop.f32.mrf.mxu1  ;;  %v1410_v15 = vrot.slane %v3719_v8, 7  ;;  %v1409_v25 = vsel %vm959_vm1, %v1406_v4, %v1408_v0  ;;  %v1431_v8 = vadd.f32 %v1429_v6, %v3727_v17  ;;  %v3793_v17 = vrot.slane %v1486_v12, %v1494_v22 }
 0x27e   : > { %v3723_v23 = vpop.f32.mrf.mxu0  ;;  %v1432_v37 = vadd.f32 %v1409_v25, %v1259_v53 }
 0x27f   : > { %v1265_v1 = vpop.f32.mrf.mxu1  ;;  %v1412_v27 = vrot.slane %v3723_v23, 7  ;;  %v1411_v32 = vsel %vm959_vm1, %v1407_v47, %v1410_v15 }
 0x280   : > { %v3729_v18 = vpop.f32.mrf.mxu0 }
 0x281   : > { %v1267_v28 = vpop.f32.mrf.mxu1  ;;  %v1414_v10 = vrot.slane %v3729_v18, 7  ;;  %v1413_v58 = vsel %vm959_vm1, %v1408_v0, %v1412_v27 }
 0x282   : > { %v3732_v26 = vpop.f32.mrf.mxu0  ;;  %v1434_v59 = vadd.f32 %v1413_v58, %v1265_v1 }
 0x283   : > { %v1271_v35 = vpop.f32.mrf.mxu1  ;;  %v1416_v40 = vrot.slane %v3732_v26, 7  ;;  %v1415_v53 = vsel %vm959_vm1, %v1410_v15, %v1414_v10 }
 0x284   : > { %v3745_v42 = vpop.f32.mrf.mxu0  ;;  %v1435_v11 = vadd.f32 %v1415_v53, %v1267_v28  ;;  %v2383_v53 = vld [vmem:[%s4098_s8 + $0x488] sm:$0xff] }
 0x285   : > { %v1418_v33 = vrot.slane %v3745_v42, 7  ;;  %v1433_v42 = vadd.f32 %v1411_v32, %v1261_v49  ;;  %v1273_v46 = vpop.f32.mrf.mxu1  ;;  %v1417_v56 = vsel %vm959_vm1, %v1412_v27, %v1416_v40  ;;  %v1023_v27 = vsel %vm1000_vm2, %v1011_v34, 0.0  ;;  %v2389_v40 = vld [vmem:[%s4098_s8 + $0x4b8] sm:$0xff] }
 0x287   : > { %v1419_v48 = vsel %vm959_vm1, %v1414_v10, %v1418_v33  ;;  %v1031_v10 = vadd.f32 %v1023_v27, %v3772_v14  ;;  %v2391_v14 = vld [vmem:[%s4098_s8 + $0x4c8] sm:$0xff]  ;;  %v2420_v27 = vld [vmem:[%s4098_s8 + $0x5b0] sm:$0xff] }
 0x288   : > { %v1437_v12 = vadd.f32 %v1419_v48, %v1273_v46  ;;  %v2382_v46 = vld [vmem:[%s4098_s8 + $0x480] sm:$0xff]  ;;  %v2381_v48 = vld [vmem:[%s4098_s8 + $0x478] sm:$0xff] }
 0x296   : > { %v1375_v54 = vpop.f32.mrf.mxu0 }
 0x297   : > { %v1446_v20 = vrot.slane %v1375_v54, 1 }
 0x298   : > { %v1377_v2 = vpop.f32.mrf.mxu0 }
 0x299   : > { %v1449_v30 = vrot.slane %v1377_v2, 1 }
 0x29a   : > { %v1381_v16 = vpop.f32.mrf.mxu0 }
 0x29b   : > { %v1447_v21 = vrot.slane %v1381_v16, 1 }
 0x29c   : > { %v1383_v29 = vpop.f32.mrf.mxu0 }
 0x29d   : > { %v1448_v62 = vsel %vm1000_vm2, %v1446_v20, %v1447_v21  ;;  %v1450_v31 = vrot.slane %v1383_v29, 1  ;;  %v1436_v20 = vadd.f32 %v1417_v56, %v1271_v35  ;;  %v2393_v35 = vld [vmem:[%s4098_s8 + $0x4d8] sm:$0xff] }
 0x29e   : > { %v1470_v23 = vadd.f32 %v1448_v62, %v1430_v24  ;;  %v1387_v36 = vpop.f32.mrf.mxu0  ;;  %v2373_v56 = vld [vmem:[%s4098_s8 + $0x438] sm:$0xff] }
 0x29f   : > { %v1451_v38 = vsel %vm1000_vm2, %v1449_v30, %v1450_v31  ;;  %v1452_v39 = vrot.slane %v1387_v36, 1 }
 0x2a0   : > { %v1478_v41 = vadd.f32 %v1470_v23, %v1025_v55  ;;  %v1471_v43 = vadd.f32 %v1451_v38, %v1431_v8  ;;  %v1389_v18 = vpop.f32.mrf.mxu0  ;;  %v2390_v38 = vld [vmem:[%s4098_s8 + $0x4c0] sm:$0xff] }
 0x2a1   : > { %v1453_v45 = vsel %vm1000_vm2, %v1447_v21, %v1452_v39  ;;  %v1454_v4 = vrot.slane %v1389_v18, 1 }
 0x2a2   : > { %v1472_v51 = vadd.f32 %v1453_v45, %v1432_v37  ;;  %v1393_v47 = vpop.f32.mrf.mxu0  ;;  %v1479_v54 = vadd.f32 %v1471_v43, %v1026_v61  ;;  %v1498_v50 = vadd.f32 %v3783_v60, %v1478_v41  ;;  %v2388_v43 = vld [vmem:[%s4098_s8 + $0x4b0] sm:$0xff] }
 0x2a3   : > { %v1455_v26 = vsel %vm1000_vm2, %v1450_v31, %v1454_v4  ;;  %v1456_v52 = vrot.slane %v1393_v47, 1  ;;  %v2379_v47 = vld [vmem:[%s4098_s8 + $0x468] sm:$0xff] }
 0x2a4   : > { %v1473_v49 = vadd.f32 %v1455_v26, %v1433_v42  ;;  %v1395_v55 = vpop.f32.mrf.mxu0  ;;  %v1499_v0 = vadd.f32 %v3793_v17, %v1479_v54  ;;  %v1480_v2 = vadd.f32 %v1472_v51, %v1027_v5  ;;  %v3809_v21 = vmax.f32 %v1498_v50, 0.0  ;;  %v2396_v5 = vld [vmem:[%s4098_s8 + $0x4f0] sm:$0xff]  ;;  %v2386_v42 = vld [vmem:[%s4098_s8 + $0x4a0] sm:$0xff]  ;;  %v2375_v26 = vld [vmem:[%s4098_s8 + $0x448] sm:$0xff] }
 0x2a5   : > { %v1457_v6 = vsel %vm1000_vm2, %v1452_v39, %v1456_v52  ;;  %v1458_v15 = vrot.slane %v1395_v55, 1  ;;  %v1468_v61 = vsel %vm1000_vm2, %v1456_v52, 0.0  ;;  %v2380_v51 = vld [vmem:[%s4098_s8 + $0x470] sm:$0xff]  ;;  %v2378_v54 = vld [vmem:[%s4098_s8 + $0x460] sm:$0xff]  ;;  %v2371_v55 = vld [vmem:[%s4098_s8 + $0x428] sm:$0xff] }
 0x2a6   : > { %v1474_v1 = vadd.f32 %v1457_v6, %v1434_v59  ;;  %v3806_v16 = vmax.f32 %v1499_v0, 0.0  ;;  %v1481_v19 = vadd.f32 %v1473_v49, %v3761_v3  ;;  %v2395_v3 = vld [vmem:[%s4098_s8 + $0x4e8] sm:$0xff]  ;;  %v1500_v8 = vadd.f32 %v3783_v60, %v1480_v2  ;;  %v2377_v59 = vld [vmem:[%s4098_s8 + $0x458] sm:$0xff]  ;;  %v2376_v50 = vld [vmem:[%s4098_s8 + $0x450] sm:$0xff] }
 0x2a7   : > { %v1459_v24 = vsel %vm1000_vm2, %v1454_v4, %v1458_v15  ;;  %v1469_v25 = vsel %vm1000_vm2, %v1458_v15, 0.0  ;;  %v1476_v30 = vadd.f32 %v1468_v61, %v1436_v20  ;;  %v2384_v4 = vld [vmem:[%s4098_s8 + $0x490] sm:$0xff]  ;;  %v2374_v52 = vld [vmem:[%s4098_s8 + $0x440] sm:$0xff]  ;;  %v2369_v2 = vld [vmem:[%s4098_s8 + $0x418] sm:$0xff] }
 0x2a8   : > { %v1475_v28 = vadd.f32 %v1459_v24, %v1435_v11  ;;  %v1477_v29 = vadd.f32 %v1469_v25, %v1437_v12  ;;  %1642 = vmatprep.mubr.f32.mxu1 %v3806_v16  ;;  %1796 = vmatprep.mubr.f32.mxu0 %v3806_v16  ;;  %v1501_v34 = vadd.f32 %v3793_v17, %v1481_v19  ;;  %v3839_v23 = vmax.f32 %v1500_v8, 0.0  ;;  %v2372_v49 = vld [vmem:[%s4098_s8 + $0x430] sm:$0xff]  ;;  %v2370_v0 = vld [vmem:[%s4098_s8 + $0x420] sm:$0xff]  ;;  %v2367_v12 = vld [vmem:[%s4098_s8 + $0x408] sm:$0xff] }
 0x2a9   : > { %1643 = vmatmul.mubr.f32.vlgmr.msra.gmra.mxu1 %v3809_v21  ;;  %1797 = vmatmul.mubr.f32.vlgmr.msra.gmra.mxu0 %v3809_v21  ;;  %v1482_v62 = vadd.f32 %v1474_v1, %v3763_v9  ;;  %v2392_v9 = vld [vmem:[%s4098_s8 + $0x4d0] sm:$0xff]  ;;  %v1484_v37 = vadd.f32 %v1476_v30, %v1031_v10  ;;  %v2366_v6 = vld [vmem:[%s4098_s8 + $0x400] sm:$0xff]  ;;  %v2429_v15 = vld [vmem:[%s4098_s8 + $0x5f8] sm:$0xff] }
 0x2aa   : > { %v1485_v31 = vadd.f32 %v1477_v29, %v1032_v44  ;;  %1887 = vmatpush1.msra.mxu1 %v2396_v5  ;;  %v1483_v32 = vadd.f32 %v1475_v28, %v3769_v13  ;;  %v3834_v33 = vmax.f32 %v1501_v34, 0.0  ;;  %v2387_v44 = vld [vmem:[%s4098_s8 + $0x4a8] sm:$0xff]  ;;  %v2368_v11 = vld [vmem:[%s4098_s8 + $0x410] sm:$0xff]  ;;  %v2425_v19 = vld [vmem:[%s4098_s8 + $0x5d8] sm:$0xff] }
 0x2ab   : > { %1888 = vmatprep.subr.mxu1 %v2395_v3  ;;  %v1502_v13 = vadd.f32 %v3783_v60, %v1482_v62  ;;  %v2428_v61 = vld [vmem:[%s4098_s8 + $0x5f0] sm:$0xff]  ;;  %v2427_v1 = vld [vmem:[%s4098_s8 + $0x5e8] sm:$0xff]  ;;  %v2422_v25 = vld [vmem:[%s4098_s8 + $0x5c0] sm:$0xff] }
 0x2ac   : > { %1889 = vmatpush1.msra.mxu1 %v2394_v7  ;;  %v1503_v36 = vadd.f32 %v3793_v17, %v1483_v32  ;;  %1648 = vmatprep.mubr.f32.mxu1 %v3834_v33  ;;  %v1505_v58 = vadd.f32 %v3793_v17, %v1485_v31  ;;  %v1504_v17 = vadd.f32 %v3783_v60, %v1484_v37  ;;  %v2385_v60 = vld [vmem:[%s4098_s8 + $0x498] sm:$0xff]  ;;  %v2424_v20 = vld [vmem:[%s4098_s8 + $0x5d0] sm:$0xff]  ;;  %v2423_v24 = vld [vmem:[%s4098_s8 + $0x5c8] sm:$0xff] }
 0x2ad   : > { %1802 = vmatprep.mubr.f32.mxu0 %v3834_v33  ;;  %1890 = vmatprep.subr.mxu1 %v2393_v35  ;;  %v3863_v41 = vmax.f32 %v1502_v13, 0.0  ;;  %v2421_v5 = vld [vmem:[%s4098_s8 + $0x5b8] sm:$0xff]  ;;  %v2419_v28 = vld [vmem:[%s4098_s8 + $0x5a8] sm:$0xff]  ;;  %v2418_v29 = vld [vmem:[%s4098_s8 + $0x5a0] sm:$0xff] }
 0x2ae   : > { %1649 = vmatmul.mubr.f32.gmra.mxu1 %v3839_v23  ;;  %v3855_v39 = vmax.f32 %v1503_v36, 0.0  ;;  %1803 = vmatmul.mubr.f32.gmra.mxu0 %v3839_v23  ;;  %v3871_v18 = vmax.f32 %v1505_v58, 0.0  ;;  %v3885_v45 = vmax.f32 %v1504_v17, 0.0  ;;  %v2417_v3 = vld [vmem:[%s4098_s8 + $0x598] sm:$0xff]  ;;  %v2416_v8 = vld [vmem:[%s4098_s8 + $0x590] sm:$0xff]  ;;  %v2415_v30 = vld [vmem:[%s4098_s8 + $0x588] sm:$0xff] }
 0x2af   : > { %1891 = vmatpush1.msra.mxu1 %v2392_v9  ;;  %v2414_v7 = vld [vmem:[%s4098_s8 + $0x580] sm:$0xff]  ;;  %v2413_v34 = vld [vmem:[%s4098_s8 + $0x578] sm:$0xff]  ;;  %v2412_v62 = vld [vmem:[%s4098_s8 + $0x570] sm:$0xff] }
 0x2b0   : > { %1892 = vmatprep.subr.mxu1 %v2391_v14  ;;  %1654 = vmatprep.mubr.f32.mxu1 %v3855_v39  ;;  %v2411_v31 = vld [vmem:[%s4098_s8 + $0x568] sm:$0xff]  ;;  %v2410_v32 = vld [vmem:[%s4098_s8 + $0x560] sm:$0xff]  ;;  %v2409_v10 = vld [vmem:[%s4098_s8 + $0x558] sm:$0xff] }
 0x2b1   : > { %1893 = vmatpush1.msra.mxu1 %v2390_v38  ;;  %1808 = vmatprep.mubr.f32.mxu0 %v3855_v39  ;;  %v2408_v35 = vld [vmem:[%s4098_s8 + $0x550] sm:$0xff]  ;;  %v2407_v9 = vld [vmem:[%s4098_s8 + $0x548] sm:$0xff]  ;;  %v2406_v36 = vld [vmem:[%s4098_s8 + $0x540] sm:$0xff] }
 0x2b2   : > { %1894 = vmatprep.subr.mxu1 %v2389_v40  ;;  %1655 = vmatmul.mubr.f32.gmra.mxu1 %v3863_v41  ;;  %v2405_v13 = vld [vmem:[%s4098_s8 + $0x538] sm:$0xff]  ;;  %v2404_v37 = vld [vmem:[%s4098_s8 + $0x530] sm:$0xff]  ;;  %v2403_v14 = vld [vmem:[%s4098_s8 + $0x528] sm:$0xff] }
 0x2b3   : > { %1809 = vmatmul.mubr.f32.gmra.mxu0 %v3863_v41  ;;  %1895 = vmatpush1.msra.mxu1 %v2388_v43  ;;  %v2402_v38 = vld [vmem:[%s4098_s8 + $0x520] sm:$0xff]  ;;  %v2401_v58 = vld [vmem:[%s4098_s8 + $0x518] sm:$0xff]  ;;  %v2400_v40 = vld [vmem:[%s4098_s8 + $0x510] sm:$0xff] }
 0x2b4   : > { %1660 = vmatprep.mubr.f32.mxu1 %v3871_v18  ;;  %1814 = vmatprep.mubr.f32.mxu0 %v3871_v18  ;;  %v2399_v43 = vld [vmem:[%s4098_s8 + $0x508] sm:$0xff]  ;;  %v2398_v17 = vld [vmem:[%s4098_s8 + $0x500] sm:$0xff] }
 0x2b5   : > { %1896 = vmatprep.subr.mxu1 %v2387_v44 }
 0x2b6   : > { %1897 = vmatpush1.msra.mxu1 %v2386_v42 }
 0x2b7   : > { %1898 = vmatprep.subr.mxu1 %v2385_v60  ;;  %1661 = vmatmul.mubr.f32.gmra.mxu1 %v3885_v45 }
 0x2b8   : > { %1815 = vmatmul.mubr.f32.gmra.mxu0 %v3885_v45  ;;  %1899 = vmatpush1.msra.mxu1 %v2384_v4 }
 0x2b9   : > { %1900 = vmatprep.subr.mxu1 %v2383_v53  ;;  %1950 = vmatprep.mubr.f32.mxu1 %v3806_v16  ;;  %v2426_v16 = vld [vmem:[%s4098_s8 + $0x5e0] sm:$0xff] }
 0x2ba   : > { %1901 = vmatpush1.msra.mxu1 %v2382_v46 }
 0x2bb   : > { %1902 = vmatprep.subr.mxu1 %v2381_v48 }
 0x2bc   : > { %1903 = vmatpush1.msra.mxu1 %v2380_v51 }
 0x2bd   : > { %1904 = vmatprep.subr.mxu1 %v2379_v47 }
 0x2be   : > { %1905 = vmatpush1.msra.mxu1 %v2378_v54 }
 0x2bf   : > { %1906 = vmatprep.subr.mxu1 %v2377_v59 }
 0x2c0   : > { %1907 = vmatpush1.msra.mxu1 %v2376_v50 }
 0x2c1   : > { %1908 = vmatprep.subr.mxu1 %v2375_v26 }
 0x2c2   : > { %1909 = vmatpush1.msra.mxu1 %v2374_v52 }
 0x2c3   : > { %1910 = vmatprep.subr.mxu1 %v2373_v56 }
 0x2c4   : > { %1911 = vmatpush1.msra.mxu1 %v2372_v49 }
 0x2c5   : > { %1912 = vmatprep.subr.mxu1 %v2371_v55 }
 0x2c6   : > { %1913 = vmatpush1.msra.mxu1 %v2370_v0 }
 0x2c7   : > { %1914 = vmatprep.subr.mxu1 %v2369_v2 }
 0x2c8   : > { %1915 = vmatpush1.msra.mxu1 %v2368_v11 }
 0x2c9   : > { %1916 = vmatprep.subr.mxu1 %v2367_v12 }
 0x2ca   : > { %1917 = vmatpush1.msra.mxu1 %v2366_v6 }
 0x2cb   : > { %1918 = vmatprep.subr.mxu1 %v2429_v15 }
 0x2cc   : > { %1919 = vmatpush2.msra.mxu1 %v2428_v61 }
 0x2cd   : > { %1920 = vmatprep.subr.mxu1 %v2427_v1 }
 0x2ce   : > { %1921 = vmatpush2.msra.mxu1 %v2426_v16 }
 0x2cf   : > { %1922 = vmatprep.subr.mxu1 %v2425_v19 }
 0x2d0   : > { %1923 = vmatpush2.msra.mxu1 %v2424_v20 }
 0x2d1   : > { %1924 = vmatprep.subr.mxu1 %v2423_v24 }
 0x2d2   : > { %1925 = vmatpush2.msra.mxu1 %v2422_v25 }
 0x2d3   : > { %1926 = vmatprep.subr.mxu1 %v2421_v5 }
 0x2d4   : > { %1927 = vmatpush2.msra.mxu1 %v2420_v27 }
 0x2d5   : > { %1928 = vmatprep.subr.mxu1 %v2419_v28 }
 0x2d6   : > { %1929 = vmatpush2.msra.mxu1 %v2418_v29 }
 0x2d7   : > { %1930 = vmatprep.subr.mxu1 %v2417_v3 }
 0x2d8   : > { %1931 = vmatpush2.msra.mxu1 %v2416_v8 }
 0x2d9   : > { %1932 = vmatprep.subr.mxu1 %v2415_v30 }
 0x2da   : > { %1933 = vmatpush2.msra.mxu1 %v2414_v7 }
 0x2db   : > { %1934 = vmatprep.subr.mxu1 %v2413_v34 }
 0x2dc   : > { %1935 = vmatpush2.msra.mxu1 %v2412_v62 }
 0x2dd   : > { %1936 = vmatprep.subr.mxu1 %v2411_v31 }
 0x2de   : > { %1937 = vmatpush2.msra.mxu1 %v2410_v32 }
 0x2df   : > { %1938 = vmatprep.subr.mxu1 %v2409_v10 }
 0x2e0   : > { %1939 = vmatpush2.msra.mxu1 %v2408_v35 }
 0x2e1   : > { %1940 = vmatprep.subr.mxu1 %v2407_v9 }
 0x2e2   : > { %1941 = vmatpush2.msra.mxu1 %v2406_v36 }
 0x2e3   : > { %1942 = vmatprep.subr.mxu1 %v2405_v13 }
 0x2e4   : > { %1943 = vmatpush2.msra.mxu1 %v2404_v37 }
 0x2e5   : > { %1944 = vmatprep.subr.mxu1 %v2403_v14 }
 0x2e6   : > { %1945 = vmatpush2.msra.mxu1 %v2402_v38 }
 0x2e7   : > { %1946 = vmatprep.subr.mxu1 %v2401_v58 }
 0x2e8   : > { %1947 = vmatpush2.msra.mxu1 %v2400_v40 }
 0x2e9   : > { %1948 = vmatprep.subr.mxu1 %v2399_v43 }
 0x2ea   : > { %1949 = vmatpush2.msra.mxu1 %v2398_v17 }
 0x2eb   : > { %1951 = vmatmul.mubr.f32.vlgmr.msra.gmra.mxu1 %v3809_v21 }
 0x2ec   : > { %1956 = vmatprep.mubr.f32.mxu1 %v3834_v33 }
 0x2ef   : > { %1957 = vmatmul.mubr.f32.gmra.mxu1 %v3839_v23 }
 0x2f0   : > { %1962 = vmatprep.mubr.f32.mxu1 %v3855_v39 }
 0x2f3   : > { %1963 = vmatmul.mubr.f32.gmra.mxu1 %v3863_v41 }
 0x2f4   : > { %1968 = vmatprep.mubr.f32.mxu1 %v3871_v18 }
 0x2f7   : > { %1969 = vmatmul.mubr.f32.gmra.mxu1 %v3885_v45  ;;  %v2055_v45 = vld [vmem:[%s4099_s9] sm:$0x3] }
 0x2f8   : > { %v2060_v15 = vrot.slane %v2055_v45, %v1490_v57  ;;  %v2064_v20 = vrot.slane %v2055_v45, %v1494_v22 }
 0x369   : > { %v1644_v44 = vpop.f32.mrf.mxu1  ;;  %v1798_v46 = vpop.f32.mrf.mxu0 }
 0x36a   : > { %v1983_v23 = vrot.slane %v1644_v44, 7 }
 0x36b   : > { %v1646_v42 = vpop.f32.mrf.mxu1  ;;  %v1800_v21 = vpop.f32.mrf.mxu0 }
 0x36c   : > { %v1984_v59 = vrot.slane %v1646_v42, 7  ;;  %v2005_v18 = vsel %vm959_vm1, 0.0, %v1983_v23 }
 0x36d   : > { %v2007_v11 = vadd.f32 %v2005_v18, %v1798_v46 }
 0x36e   : > { %v1650_v60 = vpop.f32.mrf.mxu1  ;;  %v1804_v33 = vpop.f32.mrf.mxu0  ;;  %v2006_v49 = vsel %vm959_vm1, 0.0, %v1984_v59 }
 0x36f   : > { %v1985_v41 = vrot.slane %v1650_v60, 7  ;;  %v2008_v24 = vadd.f32 %v2006_v49, %v1800_v21 }
 0x370   : > { %v1652_v4 = vpop.f32.mrf.mxu1  ;;  %v1806_v54 = vpop.f32.mrf.mxu0 }
 0x371   : > { %v1987_v26 = vrot.slane %v1652_v4, 7  ;;  %v1986_v12 = vsel %vm959_vm1, %v1983_v23, %v1985_v41 }
 0x372   : > { %v1656_v53 = vpop.f32.mrf.mxu1  ;;  %v2009_v3 = vadd.f32 %v1986_v12, %v1804_v33 }
 0x373   : > { %v1810_v52 = vpop.f32.mrf.mxu0  ;;  %v1989_v55 = vrot.slane %v1656_v53, 7  ;;  %v1988_v25 = vsel %vm959_vm1, %v1984_v59, %v1987_v26 }
 0x374   : > { %v1658_v48 = vpop.f32.mrf.mxu1  ;;  %v2010_v31 = vadd.f32 %v1988_v25, %v1806_v54 }
 0x375   : > { %v1991_v5 = vrot.slane %v1658_v48, 7  ;;  %v1812_v27 = vpop.f32.mrf.mxu0  ;;  %v1990_v8 = vsel %vm959_vm1, %v1985_v41, %v1989_v55 }
 0x376   : > { %v2011_v38 = vadd.f32 %v1990_v8, %v1810_v52 }
 0x377   : > { %v1662_v51 = vpop.f32.mrf.mxu1  ;;  %v1992_v35 = vsel %vm959_vm1, %v1987_v26, %v1991_v5 }
 0x378   : > { %v1993_v6 = vrot.slane %v1662_v51, 7  ;;  %v1816_v9 = vpop.f32.mrf.mxu0  ;;  %v2012_v53 = vadd.f32 %v1992_v35, %v1812_v27 }
 0x379   : > { %v1664_v47 = vpop.f32.mrf.mxu1 }
 0x37a   : > { %v1994_v7 = vsel %vm959_vm1, %v1989_v55, %v1993_v6  ;;  %v1995_v34 = vrot.slane %v1664_v47, 7  ;;  %v1818_v51 = vpop.f32.mrf.mxu0 }
 0x37b   : > { %v2013_v58 = vadd.f32 %v1994_v7, %v1816_v9 }
 0x37c   : > { %v1996_v17 = vsel %vm959_vm1, %v1991_v5, %v1995_v34 }
 0x3ab   : > { %v1952_v39 = vpop.f32.mrf.mxu1 }
 0x3ac   : > { %v2023_v0 = vrot.slane %v1952_v39, 1  ;;  %v2014_v39 = vadd.f32 %v1996_v17, %v1818_v51 }
 0x3ad   : > { %v1954_v50 = vpop.f32.mrf.mxu1 }
 0x3ae   : > { %v2026_v1 = vrot.slane %v1954_v50, 1 }
 0x3af   : > { %v1958_v56 = vpop.f32.mrf.mxu1 }
 0x3b0   : > { %v2024_v2 = vrot.slane %v1958_v56, 1 }
 0x3b1   : > { %v1960_v61 = vpop.f32.mrf.mxu1 }
 0x3b2   : > { %v2025_v16 = vsel %vm1000_vm2, %v2023_v0, %v2024_v2  ;;  %v2027_v19 = vrot.slane %v1960_v61, 1 }
 0x3b3   : > { %v2047_v28 = vadd.f32 %v2025_v16, %v2007_v11  ;;  %v1964_v29 = vpop.f32.mrf.mxu1 }
 0x3b4   : > { %v2028_v57 = vsel %vm1000_vm2, %v2026_v1, %v2027_v19  ;;  %v2029_v30 = vrot.slane %v1964_v29, 1 }
 0x3b5   : > { %v2067_v62 = vadd.f32 %v2060_v15, %v2047_v28  ;;  %v2048_v63 = vadd.f32 %v2028_v57, %v2008_v24  ;;  %v1966_v22 = vpop.f32.mrf.mxu1 }
 0x3b6   : > { %v2030_v32 = vsel %vm1000_vm2, %v2024_v2, %v2029_v30  ;;  %v2031_v10 = vrot.slane %v1966_v22, 1 }
 0x3b7   : > { %v2075_v36 = vmax.f32 %v2067_v62, 0.0  ;;  %v2068_v13 = vadd.f32 %v2064_v20, %v2048_v63  ;;  %v2049_v37 = vadd.f32 %v2030_v32, %v2009_v3  ;;  %v1970_v14 = vpop.f32.mrf.mxu1 }
 0x3b8   : > { %v2032_v40 = vsel %vm1000_vm2, %v2027_v19, %v2031_v10  ;;  %v2033_v43 = vrot.slane %v1970_v14, 1 }
 0x3b9   : > { %2083 = vst [vmem:[%s4069_s11] sm:$0xff] %v2075_v36  ;;  %v2076_v44 = vmax.f32 %v2068_v13, 0.0  ;;  %v2069_v42 = vadd.f32 %v2060_v15, %v2049_v37  ;;  %v2050_v60 = vadd.f32 %v2032_v40, %v2010_v31  ;;  %v1972_v4 = vpop.f32.mrf.mxu1 }
 0x3ba   : > { %v2034_v46 = vsel %vm1000_vm2, %v2029_v30, %v2033_v43  ;;  %v2045_v48 = vsel %vm1000_vm2, %v2033_v43, 0.0  ;;  %v2035_v21 = vrot.slane %v1972_v4, 1 }
 0x3bb   : > { %2084 = vst [vmem:[%s4069_s11 + $0x8] sm:$0xff] %v2076_v44  ;;  %v2077_v33 = vmax.f32 %v2069_v42, 0.0  ;;  %v2070_v47 = vadd.f32 %v2064_v20, %v2050_v60  ;;  %v2051_v23 = vadd.f32 %v2034_v46, %v2011_v38  ;;  %v2053_v54 = vadd.f32 %v2045_v48, %v2013_v58 }
 0x3bc   : > { %v2036_v59 = vsel %vm1000_vm2, %v2031_v10, %v2035_v21  ;;  %v2046_v41 = vsel %vm1000_vm2, %v2035_v21, 0.0 }
 0x3bd   : > { %2085 = vst [vmem:[%s4069_s11 + $0x10] sm:$0xff] %v2077_v33  ;;  %v2078_v50 = vmax.f32 %v2070_v47, 0.0  ;;  %v2071_v18 = vadd.f32 %v2060_v15, %v2051_v23  ;;  %v2073_v45 = vadd.f32 %v2060_v15, %v2053_v54  ;;  %v2052_v26 = vadd.f32 %v2036_v59, %v2012_v53 }
 0x3be   : > { %v2054_v52 = vadd.f32 %v2046_v41, %v2014_v39 }
 0x3bf   : > { %2086 = vst [vmem:[%s4069_s11 + $0x18] sm:$0xff] %v2078_v50  ;;  %v2079_v56 = vmax.f32 %v2071_v18, 0.0  ;;  %v2081_v49 = vmax.f32 %v2073_v45, 0.0  ;;  %v2072_v55 = vadd.f32 %v2064_v20, %v2052_v26 }
 0x3c0   : > { %v2074_v0 = vadd.f32 %v2064_v20, %v2054_v52 }
 0x3c1   : > { %2087 = vst [vmem:[%s4069_s11 + $0x20] sm:$0xff] %v2079_v56  ;;  %2089 = vst [vmem:[%s4069_s11 + $0x30] sm:$0xff] %v2081_v49  ;;  %v2080_v2 = vmax.f32 %v2072_v55, 0.0 }
 0x3c2   : > { %v2082_v11 = vmax.f32 %v2074_v0, 0.0 }
 0x3c3   : > { %2088 = vst [vmem:[%s4069_s11 + $0x28] sm:$0xff] %v2080_v2 }
 0x3c4   : > { %2090 = vst [vmem:[%s4069_s11 + $0x38] sm:$0xff] %v2082_v11 }
 0x3c5 PF: > { %s20_s13 = sadd.s32 1, %s2519_s13  }
 0x3c6   : > { %p17_p4 = scmp.ge.s32.totalorder %s20_s13, 4  }
 0x3c8   :  { %19 = sbr.rel (!%p17_p4) target bundleno = 1 (0x1), region = 99 }

</bundles_post_ra>
